<compile_context>
chip_gen: v5e
topology: v5e:2x2
jax: 0.10.0
libtpu: 0.0.40
codegen_flags: <defaults>
</compile_context>

<pallas_src>
import functools
import math

import jax
import jax.numpy as jnp
from jax.experimental import pallas as pl
from jax.experimental.pallas import tpu as pltpu

LN_EPS = 1e-5


# ---------------------------------------------------------------------------
# Fully fused EncodingLayer kernel — one grid step per batch element.
# ---------------------------------------------------------------------------
def _encoding_layer_kernel(
    x_ref,                                   # (L, E)   batch-b slice of the input
    in_w_ref, in_b_ref,                      # (E, 3E), (1, 3E)
    out_w_ref, out_b_ref,                    # (E, E),  (1, E)
    ln1_g_ref, ln1_b_ref,                    # (1, E),  (1, E)
    ffn_w1_ref, ffn_b1_ref,                  # (E, HID),(1, HID)
    ffn_w2_ref, ffn_b2_ref,                  # (HID, E),(1, E)
    ln2_g_ref, ln2_b_ref,                    # (1, E),  (1, E)
    out_ref,                                 # (L, E)
    attn_ref,                                # (L, L)   head-averaged attention weights
    *, num_heads, scale, eps):
    L, E = x_ref.shape
    Dh = E // num_heads

    x = x_ref[...].astype(jnp.float32)                                    # (L, E)

    # --- QKV projection (single MXU matmul, weight resident in VMEM) ---------------
    qkv = jnp.dot(x, in_w_ref[...], preferred_element_type=jnp.float32)
    qkv = qkv + in_b_ref[...]                                             # (L, 3E)

    # --- per-head attention; out-proj folded in per head-chunk ---------------------
    # Heads are contiguous 32-lane slices of qkv; no reshape/transpose/concat needed.
    attn_acc = jnp.zeros((L, L), jnp.float32)
    proj_acc = jnp.zeros((L, E), jnp.float32)
    for h in range(num_heads):                       # H=8, fully unrolled, tiny tensors
        q = qkv[:, h * Dh:(h + 1) * Dh] * scale                           # (L, Dh)
        k = qkv[:, E + h * Dh:E + (h + 1) * Dh]                           # (L, Dh)
        v = qkv[:, 2 * E + h * Dh:2 * E + (h + 1) * Dh]                   # (L, Dh)

        # scores[i, j] = sum_d q[i, d] * k[j, d]   (no k.T materialized)
        s = jax.lax.dot_general(q, k, (((1,), (1,)), ((), ())),
                                preferred_element_type=jnp.float32)       # (L, L)

        # numerically-stable softmax, exact divide (matches nn.MultiheadAttention)
        m = jnp.max(s, axis=-1, keepdims=True)
        e = jnp.exp(s - m)
        p = e / jnp.sum(e, axis=-1, keepdims=True)                        # (L, L) f32
        attn_acc = attn_acc + p

        ctx_h = jnp.dot(p, v, preferred_element_type=jnp.float32)         # (L, Dh)
        w_chunk = out_w_ref[h * Dh:(h + 1) * Dh, :]                       # (Dh, E)
        proj_acc = proj_acc + jnp.dot(ctx_h, w_chunk,
                                      preferred_element_type=jnp.float32)

    # nn.MultiheadAttention returns head-averaged weights per batch element.
    attn_ref[...] = (attn_acc * (1.0 / num_heads)).astype(attn_ref.dtype)

    attn_out = proj_acc + out_b_ref[...]                                  # (L, E)

    def layer_norm(t, g_ref, b_ref):
        mu = jnp.mean(t, axis=-1, keepdims=True)
        tc = t - mu
        var = jnp.mean(tc * tc, axis=-1, keepdims=True)
        return tc * jax.lax.rsqrt(var + eps) * g_ref[...] + b_ref[...]

    # --- residual + LayerNorm 1 -----------------------------------------------------
    y1 = layer_norm(attn_out + x, ln1_g_ref, ln1_b_ref)                   # (L, E)

    # --- FeedForward: Linear -> ReLU -> (Dropout p=0.0: identity) -> Linear ---------
    # TODO(synk): training-mode dropout with p>0 not implemented (module uses p=0.0).
    h1 = jnp.dot(y1, ffn_w1_ref[...], preferred_element_type=jnp.float32)
    h1 = jnp.maximum(h1 + ffn_b1_ref[...], 0.0)                           # (L, HID)
    ffn = jnp.dot(h1, ffn_w2_ref[...], preferred_element_type=jnp.float32)
    ffn = ffn + ffn_b2_ref[...]                                           # (L, E)

    # --- residual + LayerNorm 2 -----------------------------------------------------
    y2 = layer_norm(ffn + y1, ln2_g_ref, ln2_b_ref)
    out_ref[...] = y2.astype(out_ref.dtype)


def encoding_layer_forward(x, params, *, num_heads):
    """x: (L, B, E) (torch batch_first=False). Returns (x_out (L, B, E), attn (B, L, L))."""
    L, B, E = x.shape
    assert E % num_heads == 0
    Dh = E // num_heads
    HID = params["ffn_w1"].shape[1]
    scale = 1.0 / math.sqrt(Dh)

    # Zero-copy reshape: (L, B, E) -> (L, B*E); batch b occupies lanes [b*E, (b+1)*E),
    # so the per-b BlockSpec below slices it with a lane-dense (L, 256) tile.
    x2 = x.reshape(L, B * E)

    def vec2(p):                     # (N,) -> (1, N) lane-dense broadcast row
        return p.reshape(1, -1)

    def wt_spec(shape):              # full-array, VMEM-resident across grid steps
        return pl.BlockSpec(shape, lambda b: (0, 0))

    kernel = functools.partial(_encoding_layer_kernel,
                               num_heads=num_heads, scale=scale, eps=LN_EPS)

    out2, attn = pl.pallas_call(
        kernel,
        out_shape=(
            jax.ShapeDtypeStruct((L, B * E), x.dtype),
            jax.ShapeDtypeStruct((B, L, L), x.dtype),
        ),
        grid_spec=pltpu.PrefetchScalarGridSpec(
            num_scalar_prefetch=0,
            grid=(B,),
            in_specs=[
                pl.BlockSpec((L, E), lambda b: (0, b)),     # x slice for batch b
                wt_spec((E, 3 * E)), wt_spec((1, 3 * E)),   # in_proj  W, b
                wt_spec((E, E)), wt_spec((1, E)),           # out_proj W, b
                wt_spec((1, E)), wt_spec((1, E)),           # LN1 gamma, beta
                wt_spec((E, HID)), wt_spec((1, HID)),       # FFN W1, b1
                wt_spec((HID, E)), wt_spec((1, E)),         # FFN W2, b2
                wt_spec((1, E)), wt_spec((1, E)),           # LN2 gamma, beta
            ],
            out_specs=[
                pl.BlockSpec((L, E), lambda b: (0, b)),
                pl.BlockSpec((pl.Squeezed(), L, L), lambda b: (b, 0, 0)),
            ],
        ),
        compiler_params=pltpu.CompilerParams(
            dimension_semantics=("parallel",)),
    )(x2,
      params["in_proj_w"], vec2(params["in_proj_b"]),
      params["out_proj_w"], vec2(params["out_proj_b"]),
      vec2(params["ln1_g"]), vec2(params["ln1_b"]),
      params["ffn_w1"], vec2(params["ffn_b1"]),
      params["ffn_w2"], vec2(params["ffn_b2"]),
      vec2(params["ln2_g"]), vec2(params["ln2_b"]))

    return out2.reshape(L, B, E), attn


# ---------------------------------------------------------------------------
# Pure-JAX reference (mirrors torch semantics)
# ---------------------------------------------------------------------------
def _reference(x, params, *, num_heads):
    L, B, E = x.shape
    Dh = E // num_heads
    x2 = x.reshape(L * B, E).astype(jnp.float32)
    qkv = x2 @ params["in_proj_w"] + params["in_proj_b"]
    q2, k2, v2 = jnp.split(qkv, 3, axis=-1)

    def split_heads(t):
        return t.reshape(L, B, num_heads, Dh).transpose(1, 2, 0, 3)

    q, k, v = split_heads(q2), split_heads(k2), split_heads(v2)
    s = jnp.einsum("bhqd,bhkd->bhqk", q * (1.0 / math.sqrt(Dh)), k)
    p = jax.nn.softmax(s, axis=-1)
    ctx = jnp.einsum("bhqk,bhkd->bhqd", p, v)
    ctx2 = ctx.transpose(2, 0, 1, 3).reshape(L * B, E)
    attn_out = ctx2 @ params["out_proj_w"] + params["out_proj_b"]

    def layer_norm(t, g, b):
        mu = jnp.mean(t, axis=-1, keepdims=True)
        var = jnp.mean((t - mu) ** 2, axis=-1, keepdims=True)
        return (t - mu) * jax.lax.rsqrt(var + LN_EPS) * g + b

    y1 = layer_norm(attn_out + x2, params["ln1_g"], params["ln1_b"])
    h = jnp.maximum(y1 @ params["ffn_w1"] + params["ffn_b1"], 0.0)
    ffn = h @ params["ffn_w2"] + params["ffn_b2"]
    y2 = layer_norm(ffn + y1, params["ln2_g"], params["ln2_b"])
    return y2.reshape(L, B, E), p.mean(axis=1)


if __name__ == "__main__":
    L, B = 8, 2                       # seq len, batch (batch_first=False layout)
    E, H = 16 ** 2, 8                 # module defaults: dim=256, heads=8 -> head_dim=32
    HID = int(E * 0.5)                # FeedForward hidden dim = 128

    key = jax.random.PRNGKey(0)
    kx, *kp = jax.random.split(key, 13)

    def w_init(k, shape, fan_in):
        return jax.random.normal(k, shape, dtype=jnp.float32) / math.sqrt(fan_in)

    params = {
        # Linear weights stored as (in_features, out_features) == torch weight.T
        "in_proj_w": w_init(kp[0], (E, 3 * E), E),
        "in_proj_b": 0.1 * jax.random.normal(kp[1], (3 * E,), dtype=jnp.float32),
        "out_proj_w": w_init(kp[2], (E, E), E),
        "out_proj_b": 0.1 * jax.random.normal(kp[3], (E,), dtype=jnp.float32),
        "ln1_g": 1.0 + 0.1 * jax.random.normal(kp[4], (E,), dtype=jnp.float32),
        "ln1_b": 0.1 * jax.random.normal(kp[5], (E,), dtype=jnp.float32),
        "ffn_w1": w_init(kp[6], (E, HID), E),
        "ffn_b1": 0.1 * jax.random.normal(kp[7], (HID,), dtype=jnp.float32),
        "ffn_w2": w_init(kp[8], (HID, E), HID),
        "ffn_b2": 0.1 * jax.random.normal(kp[9], (E,), dtype=jnp.float32),
        "ln2_g": 1.0 + 0.1 * jax.random.normal(kp[10], (E,), dtype=jnp.float32),
        "ln2_b": 0.1 * jax.random.normal(kp[11], (E,), dtype=jnp.float32),
    }

    x = jax.random.normal(kx, (L, B, E), dtype=jnp.float32)

    fwd = jax.jit(functools.partial(encoding_layer_forward, num_heads=H))
    out, attn = fwd(x, params)
    jax.block_until_ready((out, attn))

    out_ref, attn_ref = _reference(x, params, num_heads=H)
    assert out.shape == (L, B, E) and attn.shape == (B, L, L)
    assert jnp.allclose(attn, attn_ref, atol=5e-3, rtol=5e-3), \
        float(jnp.max(jnp.abs(attn - attn_ref)))
    assert jnp.allclose(out, out_ref, atol=5e-3, rtol=5e-3), \
        float(jnp.max(jnp.abs(out - out_ref)))
    # exact softmax divide -> rows sum to 1 up to f32 rounding
    assert jnp.allclose(jnp.sum(attn, axis=-1), 1.0, atol=1e-4)

    print("KERNEL_OK")
</pallas_src>

<mosaic_0001>
module attributes {stable_mosaic.version = 11 : i64} {
  func.func @_encoding_layer_kernel(%arg0: i32, %arg1: memref<8x256xf32, #tpu.memory_space<vmem>>, %arg2: memref<256x768xf32, #tpu.memory_space<vmem>>, %arg3: memref<1x768xf32, #tpu.memory_space<vmem>>, %arg4: memref<256x256xf32, #tpu.memory_space<vmem>>, %arg5: memref<1x256xf32, #tpu.memory_space<vmem>>, %arg6: memref<1x256xf32, #tpu.memory_space<vmem>>, %arg7: memref<1x256xf32, #tpu.memory_space<vmem>>, %arg8: memref<256x128xf32, #tpu.memory_space<vmem>>, %arg9: memref<1x128xf32, #tpu.memory_space<vmem>>, %arg10: memref<128x256xf32, #tpu.memory_space<vmem>>, %arg11: memref<1x256xf32, #tpu.memory_space<vmem>>, %arg12: memref<1x256xf32, #tpu.memory_space<vmem>>, %arg13: memref<1x256xf32, #tpu.memory_space<vmem>>, %arg14: memref<8x256xf32, #tpu.memory_space<vmem>>, %arg15: memref<1x8x8xf32, #tpu.memory_space<vmem>>) attributes {dimension_semantics = [#tpu.dimension_semantics<parallel>], iteration_bounds = array<i64: 2>, scalar_prefetch = 0 : i64, scratch_operands = 0 : i64, tpu.core_type = #tpu.core_type<tc>, window_params = [{transform_indices = @transform_0, window_bounds = array<i64: 8, 256>}, {pipeline_mode = #tpu.pipeline_mode<synchronous>, transform_indices = @transform_1, window_bounds = array<i64: 256, 768>}, {pipeline_mode = #tpu.pipeline_mode<synchronous>, transform_indices = @transform_2, window_bounds = array<i64: 1, 768>}, {pipeline_mode = #tpu.pipeline_mode<synchronous>, transform_indices = @transform_3, window_bounds = array<i64: 256, 256>}, {pipeline_mode = #tpu.pipeline_mode<synchronous>, transform_indices = @transform_4, window_bounds = array<i64: 1, 256>}, {pipeline_mode = #tpu.pipeline_mode<synchronous>, transform_indices = @transform_5, window_bounds = array<i64: 1, 256>}, {pipeline_mode = #tpu.pipeline_mode<synchronous>, transform_indices = @transform_6, window_bounds = array<i64: 1, 256>}, {pipeline_mode = #tpu.pipeline_mode<synchronous>, transform_indices = @transform_7, window_bounds = array<i64: 256, 128>}, {pipeline_mode = #tpu.pipeline_mode<synchronous>, transform_indices = @transform_8, window_bounds = array<i64: 1, 128>}, {pipeline_mode = #tpu.pipeline_mode<synchronous>, transform_indices = @transform_9, window_bounds = array<i64: 128, 256>}, {pipeline_mode = #tpu.pipeline_mode<synchronous>, transform_indices = @transform_10, window_bounds = array<i64: 1, 256>}, {pipeline_mode = #tpu.pipeline_mode<synchronous>, transform_indices = @transform_11, window_bounds = array<i64: 1, 256>}, {pipeline_mode = #tpu.pipeline_mode<synchronous>, transform_indices = @transform_12, window_bounds = array<i64: 1, 256>}, {transform_indices = @transform_13, window_bounds = array<i64: 8, 256>}, {transform_indices = @transform_14, window_bounds = array<i64: 1, 8, 8>}]} {
    %c0 = arith.constant 0 : index
    %c0_0 = arith.constant 0 : index
    %0 = vector.load %arg1[%c0, %c0_0] : memref<8x256xf32, #tpu.memory_space<vmem>>, vector<8x256xf32>
    %c0_1 = arith.constant 0 : index
    %c0_2 = arith.constant 0 : index
    %1 = vector.load %arg2[%c0_1, %c0_2] : memref<256x768xf32, #tpu.memory_space<vmem>>, vector<256x768xf32>
    %cst = arith.constant dense<0.000000e+00> : vector<8x768xf32>
    %2 = tpu.matmul %0, %1, %cst {dimension_numbers = #tpu.dot_dimension_numbers<[1], [0], [0], [1], [0, 0, 1, 1], [], []>} : vector<8x256xf32>, vector<256x768xf32>, vector<8x768xf32> -> vector<8x768xf32>
    %c0_3 = arith.constant 0 : index
    %c0_4 = arith.constant 0 : index
    %3 = vector.load %arg3[%c0_3, %c0_4] : memref<1x768xf32, #tpu.memory_space<vmem>>, vector<1x768xf32>
    %4 = vector.broadcast %3 : vector<1x768xf32> to vector<8x768xf32>
    %5 = arith.addf %2, %4 : vector<8x768xf32>
    %cst_5 = arith.constant 0.000000e+00 : f32
    %6 = vector.broadcast %cst_5 : f32 to vector<8x8xf32>
    %cst_6 = arith.constant 0.000000e+00 : f32
    %7 = vector.broadcast %cst_6 : f32 to vector<8x256xf32>
    %8 = vector.extract_strided_slice %5 {offsets = [0, 0], sizes = [8, 32], strides = [1, 1]} : vector<8x768xf32> to vector<8x32xf32>
    %cst_7 = arith.constant 0.176776692 : f32
    %9 = vector.broadcast %cst_7 : f32 to vector<8x32xf32>
    %10 = arith.mulf %8, %9 : vector<8x32xf32>
    %11 = vector.extract_strided_slice %5 {offsets = [0, 256], sizes = [8, 32], strides = [1, 1]} : vector<8x768xf32> to vector<8x32xf32>
    %12 = vector.extract_strided_slice %5 {offsets = [0, 512], sizes = [8, 32], strides = [1, 1]} : vector<8x768xf32> to vector<8x32xf32>
    %cst_8 = arith.constant dense<0.000000e+00> : vector<8x8xf32>
    %13 = tpu.matmul %10, %11, %cst_8 {dimension_numbers = #tpu.dot_dimension_numbers<[1], [1], [0], [0], [0, 0, 1, 0], [], []>} : vector<8x32xf32>, vector<8x32xf32>, vector<8x8xf32> -> vector<8x8xf32>
    %cst_9 = arith.constant dense<0xFF800000> : vector<8xf32>
    %14 = vector.multi_reduction <maximumf>, %13, %cst_9 [1] : vector<8x8xf32> to vector<8xf32>
    %15 = vector.shape_cast %14 : vector<8xf32> to vector<8x1xf32>
    %16 = vector.broadcast %15 : vector<8x1xf32> to vector<8x8xf32>
    %17 = arith.subf %13, %16 : vector<8x8xf32>
    %18 = math.exp %17 : vector<8x8xf32>
    %cst_10 = arith.constant dense<0.000000e+00> : vector<8xf32>
    %19 = vector.multi_reduction <add>, %18, %cst_10 [1] : vector<8x8xf32> to vector<8xf32>
    %20 = vector.shape_cast %19 : vector<8xf32> to vector<8x1xf32>
    %21 = vector.broadcast %20 : vector<8x1xf32> to vector<8x8xf32>
    %22 = arith.divf %18, %21 : vector<8x8xf32>
    %23 = arith.addf %6, %22 : vector<8x8xf32>
    %cst_11 = arith.constant dense<0.000000e+00> : vector<8x32xf32>
    %24 = tpu.matmul %22, %12, %cst_11 {dimension_numbers = #tpu.dot_dimension_numbers<[1], [0], [0], [1], [0, 0, 1, 1], [], []>} : vector<8x8xf32>, vector<8x32xf32>, vector<8x32xf32> -> vector<8x32xf32>
    %c0_12 = arith.constant 0 : index
    %c0_13 = arith.constant 0 : index
    %25 = vector.load %arg4[%c0_12, %c0_13] : memref<256x256xf32, #tpu.memory_space<vmem>>, vector<32x256xf32>
    %cst_14 = arith.constant dense<0.000000e+00> : vector<8x256xf32>
    %26 = tpu.matmul %24, %25, %cst_14 {dimension_numbers = #tpu.dot_dimension_numbers<[1], [0], [0], [1], [0, 0, 1, 1], [], []>} : vector<8x32xf32>, vector<32x256xf32>, vector<8x256xf32> -> vector<8x256xf32>
    %27 = arith.addf %7, %26 : vector<8x256xf32>
    %28 = vector.extract_strided_slice %5 {offsets = [0, 32], sizes = [8, 32], strides = [1, 1]} : vector<8x768xf32> to vector<8x32xf32>
    %cst_15 = arith.constant 0.176776692 : f32
    %29 = vector.broadcast %cst_15 : f32 to vector<8x32xf32>
    %30 = arith.mulf %28, %29 : vector<8x32xf32>
    %31 = vector.extract_strided_slice %5 {offsets = [0, 288], sizes = [8, 32], strides = [1, 1]} : vector<8x768xf32> to vector<8x32xf32>
    %32 = vector.extract_strided_slice %5 {offsets = [0, 544], sizes = [8, 32], strides = [1, 1]} : vector<8x768xf32> to vector<8x32xf32>
    %cst_16 = arith.constant dense<0.000000e+00> : vector<8x8xf32>
    %33 = tpu.matmul %30, %31, %cst_16 {dimension_numbers = #tpu.dot_dimension_numbers<[1], [1], [0], [0], [0, 0, 1, 0], [], []>} : vector<8x32xf32>, vector<8x32xf32>, vector<8x8xf32> -> vector<8x8xf32>
    %cst_17 = arith.constant dense<0xFF800000> : vector<8xf32>
    %34 = vector.multi_reduction <maximumf>, %33, %cst_17 [1] : vector<8x8xf32> to vector<8xf32>
    %35 = vector.shape_cast %34 : vector<8xf32> to vector<8x1xf32>
    %36 = vector.broadcast %35 : vector<8x1xf32> to vector<8x8xf32>
    %37 = arith.subf %33, %36 : vector<8x8xf32>
    %38 = math.exp %37 : vector<8x8xf32>
    %cst_18 = arith.constant dense<0.000000e+00> : vector<8xf32>
    %39 = vector.multi_reduction <add>, %38, %cst_18 [1] : vector<8x8xf32> to vector<8xf32>
    %40 = vector.shape_cast %39 : vector<8xf32> to vector<8x1xf32>
    %41 = vector.broadcast %40 : vector<8x1xf32> to vector<8x8xf32>
    %42 = arith.divf %38, %41 : vector<8x8xf32>
    %43 = arith.addf %23, %42 : vector<8x8xf32>
    %cst_19 = arith.constant dense<0.000000e+00> : vector<8x32xf32>
    %44 = tpu.matmul %42, %32, %cst_19 {dimension_numbers = #tpu.dot_dimension_numbers<[1], [0], [0], [1], [0, 0, 1, 1], [], []>} : vector<8x8xf32>, vector<8x32xf32>, vector<8x32xf32> -> vector<8x32xf32>
    %c32 = arith.constant 32 : index
    %c0_20 = arith.constant 0 : index
    %45 = vector.load %arg4[%c32, %c0_20] : memref<256x256xf32, #tpu.memory_space<vmem>>, vector<32x256xf32>
    %cst_21 = arith.constant dense<0.000000e+00> : vector<8x256xf32>
    %46 = tpu.matmul %44, %45, %cst_21 {dimension_numbers = #tpu.dot_dimension_numbers<[1], [0], [0], [1], [0, 0, 1, 1], [], []>} : vector<8x32xf32>, vector<32x256xf32>, vector<8x256xf32> -> vector<8x256xf32>
    %47 = arith.addf %27, %46 : vector<8x256xf32>
    %48 = vector.extract_strided_slice %5 {offsets = [0, 64], sizes = [8, 32], strides = [1, 1]} : vector<8x768xf32> to vector<8x32xf32>
    %cst_22 = arith.constant 0.176776692 : f32
    %49 = vector.broadcast %cst_22 : f32 to vector<8x32xf32>
    %50 = arith.mulf %48, %49 : vector<8x32xf32>
    %51 = vector.extract_strided_slice %5 {offsets = [0, 320], sizes = [8, 32], strides = [1, 1]} : vector<8x768xf32> to vector<8x32xf32>
    %52 = vector.extract_strided_slice %5 {offsets = [0, 576], sizes = [8, 32], strides = [1, 1]} : vector<8x768xf32> to vector<8x32xf32>
    %cst_23 = arith.constant dense<0.000000e+00> : vector<8x8xf32>
    %53 = tpu.matmul %50, %51, %cst_23 {dimension_numbers = #tpu.dot_dimension_numbers<[1], [1], [0], [0], [0, 0, 1, 0], [], []>} : vector<8x32xf32>, vector<8x32xf32>, vector<8x8xf32> -> vector<8x8xf32>
    %cst_24 = arith.constant dense<0xFF800000> : vector<8xf32>
    %54 = vector.multi_reduction <maximumf>, %53, %cst_24 [1] : vector<8x8xf32> to vector<8xf32>
    %55 = vector.shape_cast %54 : vector<8xf32> to vector<8x1xf32>
    %56 = vector.broadcast %55 : vector<8x1xf32> to vector<8x8xf32>
    %57 = arith.subf %53, %56 : vector<8x8xf32>
    %58 = math.exp %57 : vector<8x8xf32>
    %cst_25 = arith.constant dense<0.000000e+00> : vector<8xf32>
    %59 = vector.multi_reduction <add>, %58, %cst_25 [1] : vector<8x8xf32> to vector<8xf32>
    %60 = vector.shape_cast %59 : vector<8xf32> to vector<8x1xf32>
    %61 = vector.broadcast %60 : vector<8x1xf32> to vector<8x8xf32>
    %62 = arith.divf %58, %61 : vector<8x8xf32>
    %63 = arith.addf %43, %62 : vector<8x8xf32>
    %cst_26 = arith.constant dense<0.000000e+00> : vector<8x32xf32>
    %64 = tpu.matmul %62, %52, %cst_26 {dimension_numbers = #tpu.dot_dimension_numbers<[1], [0], [0], [1], [0, 0, 1, 1], [], []>} : vector<8x8xf32>, vector<8x32xf32>, vector<8x32xf32> -> vector<8x32xf32>
    %c64 = arith.constant 64 : index
    %c0_27 = arith.constant 0 : index
    %65 = vector.load %arg4[%c64, %c0_27] : memref<256x256xf32, #tpu.memory_space<vmem>>, vector<32x256xf32>
    %cst_28 = arith.constant dense<0.000000e+00> : vector<8x256xf32>
    %66 = tpu.matmul %64, %65, %cst_28 {dimension_numbers = #tpu.dot_dimension_numbers<[1], [0], [0], [1], [0, 0, 1, 1], [], []>} : vector<8x32xf32>, vector<32x256xf32>, vector<8x256xf32> -> vector<8x256xf32>
    %67 = arith.addf %47, %66 : vector<8x256xf32>
    %68 = vector.extract_strided_slice %5 {offsets = [0, 96], sizes = [8, 32], strides = [1, 1]} : vector<8x768xf32> to vector<8x32xf32>
    %cst_29 = arith.constant 0.176776692 : f32
    %69 = vector.broadcast %cst_29 : f32 to vector<8x32xf32>
    %70 = arith.mulf %68, %69 : vector<8x32xf32>
    %71 = vector.extract_strided_slice %5 {offsets = [0, 352], sizes = [8, 32], strides = [1, 1]} : vector<8x768xf32> to vector<8x32xf32>
    %72 = vector.extract_strided_slice %5 {offsets = [0, 608], sizes = [8, 32], strides = [1, 1]} : vector<8x768xf32> to vector<8x32xf32>
    %cst_30 = arith.constant dense<0.000000e+00> : vector<8x8xf32>
    %73 = tpu.matmul %70, %71, %cst_30 {dimension_numbers = #tpu.dot_dimension_numbers<[1], [1], [0], [0], [0, 0, 1, 0], [], []>} : vector<8x32xf32>, vector<8x32xf32>, vector<8x8xf32> -> vector<8x8xf32>
    %cst_31 = arith.constant dense<0xFF800000> : vector<8xf32>
    %74 = vector.multi_reduction <maximumf>, %73, %cst_31 [1] : vector<8x8xf32> to vector<8xf32>
    %75 = vector.shape_cast %74 : vector<8xf32> to vector<8x1xf32>
    %76 = vector.broadcast %75 : vector<8x1xf32> to vector<8x8xf32>
    %77 = arith.subf %73, %76 : vector<8x8xf32>
    %78 = math.exp %77 : vector<8x8xf32>
    %cst_32 = arith.constant dense<0.000000e+00> : vector<8xf32>
    %79 = vector.multi_reduction <add>, %78, %cst_32 [1] : vector<8x8xf32> to vector<8xf32>
    %80 = vector.shape_cast %79 : vector<8xf32> to vector<8x1xf32>
    %81 = vector.broadcast %80 : vector<8x1xf32> to vector<8x8xf32>
    %82 = arith.divf %78, %81 : vector<8x8xf32>
    %83 = arith.addf %63, %82 : vector<8x8xf32>
    %cst_33 = arith.constant dense<0.000000e+00> : vector<8x32xf32>
    %84 = tpu.matmul %82, %72, %cst_33 {dimension_numbers = #tpu.dot_dimension_numbers<[1], [0], [0], [1], [0, 0, 1, 1], [], []>} : vector<8x8xf32>, vector<8x32xf32>, vector<8x32xf32> -> vector<8x32xf32>
    %c96 = arith.constant 96 : index
    %c0_34 = arith.constant 0 : index
    %85 = vector.load %arg4[%c96, %c0_34] : memref<256x256xf32, #tpu.memory_space<vmem>>, vector<32x256xf32>
    %cst_35 = arith.constant dense<0.000000e+00> : vector<8x256xf32>
    %86 = tpu.matmul %84, %85, %cst_35 {dimension_numbers = #tpu.dot_dimension_numbers<[1], [0], [0], [1], [0, 0, 1, 1], [], []>} : vector<8x32xf32>, vector<32x256xf32>, vector<8x256xf32> -> vector<8x256xf32>
    %87 = arith.addf %67, %86 : vector<8x256xf32>
    %88 = vector.extract_strided_slice %5 {offsets = [0, 128], sizes = [8, 32], strides = [1, 1]} : vector<8x768xf32> to vector<8x32xf32>
    %cst_36 = arith.constant 0.176776692 : f32
    %89 = vector.broadcast %cst_36 : f32 to vector<8x32xf32>
    %90 = arith.mulf %88, %89 : vector<8x32xf32>
    %91 = vector.extract_strided_slice %5 {offsets = [0, 384], sizes = [8, 32], strides = [1, 1]} : vector<8x768xf32> to vector<8x32xf32>
    %92 = vector.extract_strided_slice %5 {offsets = [0, 640], sizes = [8, 32], strides = [1, 1]} : vector<8x768xf32> to vector<8x32xf32>
    %cst_37 = arith.constant dense<0.000000e+00> : vector<8x8xf32>
    %93 = tpu.matmul %90, %91, %cst_37 {dimension_numbers = #tpu.dot_dimension_numbers<[1], [1], [0], [0], [0, 0, 1, 0], [], []>} : vector<8x32xf32>, vector<8x32xf32>, vector<8x8xf32> -> vector<8x8xf32>
    %cst_38 = arith.constant dense<0xFF800000> : vector<8xf32>
    %94 = vector.multi_reduction <maximumf>, %93, %cst_38 [1] : vector<8x8xf32> to vector<8xf32>
    %95 = vector.shape_cast %94 : vector<8xf32> to vector<8x1xf32>
    %96 = vector.broadcast %95 : vector<8x1xf32> to vector<8x8xf32>
    %97 = arith.subf %93, %96 : vector<8x8xf32>
    %98 = math.exp %97 : vector<8x8xf32>
    %cst_39 = arith.constant dense<0.000000e+00> : vector<8xf32>
    %99 = vector.multi_reduction <add>, %98, %cst_39 [1] : vector<8x8xf32> to vector<8xf32>
    %100 = vector.shape_cast %99 : vector<8xf32> to vector<8x1xf32>
    %101 = vector.broadcast %100 : vector<8x1xf32> to vector<8x8xf32>
    %102 = arith.divf %98, %101 : vector<8x8xf32>
    %103 = arith.addf %83, %102 : vector<8x8xf32>
    %cst_40 = arith.constant dense<0.000000e+00> : vector<8x32xf32>
    %104 = tpu.matmul %102, %92, %cst_40 {dimension_numbers = #tpu.dot_dimension_numbers<[1], [0], [0], [1], [0, 0, 1, 1], [], []>} : vector<8x8xf32>, vector<8x32xf32>, vector<8x32xf32> -> vector<8x32xf32>
    %c128 = arith.constant 128 : index
    %c0_41 = arith.constant 0 : index
    %105 = vector.load %arg4[%c128, %c0_41] : memref<256x256xf32, #tpu.memory_space<vmem>>, vector<32x256xf32>
    %cst_42 = arith.constant dense<0.000000e+00> : vector<8x256xf32>
    %106 = tpu.matmul %104, %105, %cst_42 {dimension_numbers = #tpu.dot_dimension_numbers<[1], [0], [0], [1], [0, 0, 1, 1], [], []>} : vector<8x32xf32>, vector<32x256xf32>, vector<8x256xf32> -> vector<8x256xf32>
    %107 = arith.addf %87, %106 : vector<8x256xf32>
    %108 = vector.extract_strided_slice %5 {offsets = [0, 160], sizes = [8, 32], strides = [1, 1]} : vector<8x768xf32> to vector<8x32xf32>
    %cst_43 = arith.constant 0.176776692 : f32
    %109 = vector.broadcast %cst_43 : f32 to vector<8x32xf32>
    %110 = arith.mulf %108, %109 : vector<8x32xf32>
    %111 = vector.extract_strided_slice %5 {offsets = [0, 416], sizes = [8, 32], strides = [1, 1]} : vector<8x768xf32> to vector<8x32xf32>
    %112 = vector.extract_strided_slice %5 {offsets = [0, 672], sizes = [8, 32], strides = [1, 1]} : vector<8x768xf32> to vector<8x32xf32>
    %cst_44 = arith.constant dense<0.000000e+00> : vector<8x8xf32>
    %113 = tpu.matmul %110, %111, %cst_44 {dimension_numbers = #tpu.dot_dimension_numbers<[1], [1], [0], [0], [0, 0, 1, 0], [], []>} : vector<8x32xf32>, vector<8x32xf32>, vector<8x8xf32> -> vector<8x8xf32>
    %cst_45 = arith.constant dense<0xFF800000> : vector<8xf32>
    %114 = vector.multi_reduction <maximumf>, %113, %cst_45 [1] : vector<8x8xf32> to vector<8xf32>
    %115 = vector.shape_cast %114 : vector<8xf32> to vector<8x1xf32>
    %116 = vector.broadcast %115 : vector<8x1xf32> to vector<8x8xf32>
    %117 = arith.subf %113, %116 : vector<8x8xf32>
    %118 = math.exp %117 : vector<8x8xf32>
    %cst_46 = arith.constant dense<0.000000e+00> : vector<8xf32>
    %119 = vector.multi_reduction <add>, %118, %cst_46 [1] : vector<8x8xf32> to vector<8xf32>
    %120 = vector.shape_cast %119 : vector<8xf32> to vector<8x1xf32>
    %121 = vector.broadcast %120 : vector<8x1xf32> to vector<8x8xf32>
    %122 = arith.divf %118, %121 : vector<8x8xf32>
    %123 = arith.addf %103, %122 : vector<8x8xf32>
    %cst_47 = arith.constant dense<0.000000e+00> : vector<8x32xf32>
    %124 = tpu.matmul %122, %112, %cst_47 {dimension_numbers = #tpu.dot_dimension_numbers<[1], [0], [0], [1], [0, 0, 1, 1], [], []>} : vector<8x8xf32>, vector<8x32xf32>, vector<8x32xf32> -> vector<8x32xf32>
    %c160 = arith.constant 160 : index
    %c0_48 = arith.constant 0 : index
    %125 = vector.load %arg4[%c160, %c0_48] : memref<256x256xf32, #tpu.memory_space<vmem>>, vector<32x256xf32>
    %cst_49 = arith.constant dense<0.000000e+00> : vector<8x256xf32>
    %126 = tpu.matmul %124, %125, %cst_49 {dimension_numbers = #tpu.dot_dimension_numbers<[1], [0], [0], [1], [0, 0, 1, 1], [], []>} : vector<8x32xf32>, vector<32x256xf32>, vector<8x256xf32> -> vector<8x256xf32>
    %127 = arith.addf %107, %126 : vector<8x256xf32>
    %128 = vector.extract_strided_slice %5 {offsets = [0, 192], sizes = [8, 32], strides = [1, 1]} : vector<8x768xf32> to vector<8x32xf32>
    %cst_50 = arith.constant 0.176776692 : f32
    %129 = vector.broadcast %cst_50 : f32 to vector<8x32xf32>
    %130 = arith.mulf %128, %129 : vector<8x32xf32>
    %131 = vector.extract_strided_slice %5 {offsets = [0, 448], sizes = [8, 32], strides = [1, 1]} : vector<8x768xf32> to vector<8x32xf32>
    %132 = vector.extract_strided_slice %5 {offsets = [0, 704], sizes = [8, 32], strides = [1, 1]} : vector<8x768xf32> to vector<8x32xf32>
    %cst_51 = arith.constant dense<0.000000e+00> : vector<8x8xf32>
    %133 = tpu.matmul %130, %131, %cst_51 {dimension_numbers = #tpu.dot_dimension_numbers<[1], [1], [0], [0], [0, 0, 1, 0], [], []>} : vector<8x32xf32>, vector<8x32xf32>, vector<8x8xf32> -> vector<8x8xf32>
    %cst_52 = arith.constant dense<0xFF800000> : vector<8xf32>
    %134 = vector.multi_reduction <maximumf>, %133, %cst_52 [1] : vector<8x8xf32> to vector<8xf32>
    %135 = vector.shape_cast %134 : vector<8xf32> to vector<8x1xf32>
    %136 = vector.broadcast %135 : vector<8x1xf32> to vector<8x8xf32>
    %137 = arith.subf %133, %136 : vector<8x8xf32>
    %138 = math.exp %137 : vector<8x8xf32>
    %cst_53 = arith.constant dense<0.000000e+00> : vector<8xf32>
    %139 = vector.multi_reduction <add>, %138, %cst_53 [1] : vector<8x8xf32> to vector<8xf32>
    %140 = vector.shape_cast %139 : vector<8xf32> to vector<8x1xf32>
    %141 = vector.broadcast %140 : vector<8x1xf32> to vector<8x8xf32>
    %142 = arith.divf %138, %141 : vector<8x8xf32>
    %143 = arith.addf %123, %142 : vector<8x8xf32>
    %cst_54 = arith.constant dense<0.000000e+00> : vector<8x32xf32>
    %144 = tpu.matmul %142, %132, %cst_54 {dimension_numbers = #tpu.dot_dimension_numbers<[1], [0], [0], [1], [0, 0, 1, 1], [], []>} : vector<8x8xf32>, vector<8x32xf32>, vector<8x32xf32> -> vector<8x32xf32>
    %c192 = arith.constant 192 : index
    %c0_55 = arith.constant 0 : index
    %145 = vector.load %arg4[%c192, %c0_55] : memref<256x256xf32, #tpu.memory_space<vmem>>, vector<32x256xf32>
    %cst_56 = arith.constant dense<0.000000e+00> : vector<8x256xf32>
    %146 = tpu.matmul %144, %145, %cst_56 {dimension_numbers = #tpu.dot_dimension_numbers<[1], [0], [0], [1], [0, 0, 1, 1], [], []>} : vector<8x32xf32>, vector<32x256xf32>, vector<8x256xf32> -> vector<8x256xf32>
    %147 = arith.addf %127, %146 : vector<8x256xf32>
    %148 = vector.extract_strided_slice %5 {offsets = [0, 224], sizes = [8, 32], strides = [1, 1]} : vector<8x768xf32> to vector<8x32xf32>
    %cst_57 = arith.constant 0.176776692 : f32
    %149 = vector.broadcast %cst_57 : f32 to vector<8x32xf32>
    %150 = arith.mulf %148, %149 : vector<8x32xf32>
    %151 = vector.extract_strided_slice %5 {offsets = [0, 480], sizes = [8, 32], strides = [1, 1]} : vector<8x768xf32> to vector<8x32xf32>
    %152 = vector.extract_strided_slice %5 {offsets = [0, 736], sizes = [8, 32], strides = [1, 1]} : vector<8x768xf32> to vector<8x32xf32>
    %cst_58 = arith.constant dense<0.000000e+00> : vector<8x8xf32>
    %153 = tpu.matmul %150, %151, %cst_58 {dimension_numbers = #tpu.dot_dimension_numbers<[1], [1], [0], [0], [0, 0, 1, 0], [], []>} : vector<8x32xf32>, vector<8x32xf32>, vector<8x8xf32> -> vector<8x8xf32>
    %cst_59 = arith.constant dense<0xFF800000> : vector<8xf32>
    %154 = vector.multi_reduction <maximumf>, %153, %cst_59 [1] : vector<8x8xf32> to vector<8xf32>
    %155 = vector.shape_cast %154 : vector<8xf32> to vector<8x1xf32>
    %156 = vector.broadcast %155 : vector<8x1xf32> to vector<8x8xf32>
    %157 = arith.subf %153, %156 : vector<8x8xf32>
    %158 = math.exp %157 : vector<8x8xf32>
    %cst_60 = arith.constant dense<0.000000e+00> : vector<8xf32>
    %159 = vector.multi_reduction <add>, %158, %cst_60 [1] : vector<8x8xf32> to vector<8xf32>
    %160 = vector.shape_cast %159 : vector<8xf32> to vector<8x1xf32>
    %161 = vector.broadcast %160 : vector<8x1xf32> to vector<8x8xf32>
    %162 = arith.divf %158, %161 : vector<8x8xf32>
    %163 = arith.addf %143, %162 : vector<8x8xf32>
    %cst_61 = arith.constant dense<0.000000e+00> : vector<8x32xf32>
    %164 = tpu.matmul %162, %152, %cst_61 {dimension_numbers = #tpu.dot_dimension_numbers<[1], [0], [0], [1], [0, 0, 1, 1], [], []>} : vector<8x8xf32>, vector<8x32xf32>, vector<8x32xf32> -> vector<8x32xf32>
    %c224 = arith.constant 224 : index
    %c0_62 = arith.constant 0 : index
    %165 = vector.load %arg4[%c224, %c0_62] : memref<256x256xf32, #tpu.memory_space<vmem>>, vector<32x256xf32>
    %cst_63 = arith.constant dense<0.000000e+00> : vector<8x256xf32>
    %166 = tpu.matmul %164, %165, %cst_63 {dimension_numbers = #tpu.dot_dimension_numbers<[1], [0], [0], [1], [0, 0, 1, 1], [], []>} : vector<8x32xf32>, vector<32x256xf32>, vector<8x256xf32> -> vector<8x256xf32>
    %167 = arith.addf %147, %166 : vector<8x256xf32>
    %cst_64 = arith.constant 1.250000e-01 : f32
    %168 = vector.broadcast %cst_64 : f32 to vector<8x8xf32>
    %169 = arith.mulf %163, %168 : vector<8x8xf32>
    %c0_65 = arith.constant 0 : index
    %c0_66 = arith.constant 0 : index
    %c0_67 = arith.constant 0 : index
    %170 = vector.load %arg15[%c0_65, %c0_66, %c0_67] : memref<1x8x8xf32, #tpu.memory_space<vmem>>, vector<1x8x8xf32>
    %171 = vector.shape_cast %170 : vector<1x8x8xf32> to vector<8x8xf32>
    %172 = vector.shape_cast %169 : vector<8x8xf32> to vector<1x8x8xf32>
    tpu.vector_store %arg15[%c0_65, %c0_66, %c0_67], %172 {strides = array<i32>} : memref<1x8x8xf32, #tpu.memory_space<vmem>>, vector<1x8x8xf32>,
    %c0_68 = arith.constant 0 : index
    %c0_69 = arith.constant 0 : index
    %173 = vector.load %arg5[%c0_68, %c0_69] : memref<1x256xf32, #tpu.memory_space<vmem>>, vector<1x256xf32>
    %174 = vector.broadcast %173 : vector<1x256xf32> to vector<8x256xf32>
    %175 = arith.addf %167, %174 : vector<8x256xf32>
    %176 = arith.addf %175, %0 : vector<8x256xf32>
    %cst_70 = arith.constant dense<0.000000e+00> : vector<8xf32>
    %177 = vector.multi_reduction <add>, %176, %cst_70 [1] : vector<8x256xf32> to vector<8xf32>
    %178 = vector.shape_cast %177 : vector<8xf32> to vector<8x1xf32>
    %cst_71 = arith.constant 2.560000e+02 : f32
    %179 = vector.broadcast %cst_71 : f32 to vector<8x1xf32>
    %180 = arith.divf %178, %179 : vector<8x1xf32>
    %181 = vector.broadcast %180 : vector<8x1xf32> to vector<8x256xf32>
    %182 = arith.subf %176, %181 : vector<8x256xf32>
    %183 = arith.mulf %182, %182 : vector<8x256xf32>
    %cst_72 = arith.constant dense<0.000000e+00> : vector<8xf32>
    %184 = vector.multi_reduction <add>, %183, %cst_72 [1] : vector<8x256xf32> to vector<8xf32>
    %185 = vector.shape_cast %184 : vector<8xf32> to vector<8x1xf32>
    %cst_73 = arith.constant 2.560000e+02 : f32
    %186 = vector.broadcast %cst_73 : f32 to vector<8x1xf32>
    %187 = arith.divf %185, %186 : vector<8x1xf32>
    %cst_74 = arith.constant 9.99999974E-6 : f32
    %188 = vector.broadcast %cst_74 : f32 to vector<8x1xf32>
    %189 = arith.addf %187, %188 : vector<8x1xf32>
    %190 = math.rsqrt %189 : vector<8x1xf32>
    %191 = vector.broadcast %190 : vector<8x1xf32> to vector<8x256xf32>
    %192 = arith.mulf %182, %191 : vector<8x256xf32>
    %c0_75 = arith.constant 0 : index
    %c0_76 = arith.constant 0 : index
    %193 = vector.load %arg6[%c0_75, %c0_76] : memref<1x256xf32, #tpu.memory_space<vmem>>, vector<1x256xf32>
    %194 = vector.broadcast %193 : vector<1x256xf32> to vector<8x256xf32>
    %195 = arith.mulf %192, %194 : vector<8x256xf32>
    %c0_77 = arith.constant 0 : index
    %c0_78 = arith.constant 0 : index
    %196 = vector.load %arg7[%c0_77, %c0_78] : memref<1x256xf32, #tpu.memory_space<vmem>>, vector<1x256xf32>
    %197 = vector.broadcast %196 : vector<1x256xf32> to vector<8x256xf32>
    %198 = arith.addf %195, %197 : vector<8x256xf32>
    %c0_79 = arith.constant 0 : index
    %c0_80 = arith.constant 0 : index
    %199 = vector.load %arg8[%c0_79, %c0_80] : memref<256x128xf32, #tpu.memory_space<vmem>>, vector<256x128xf32>
    %cst_81 = arith.constant dense<0.000000e+00> : vector<8x128xf32>
    %200 = tpu.matmul %198, %199, %cst_81 {dimension_numbers = #tpu.dot_dimension_numbers<[1], [0], [0], [1], [0, 0, 1, 1], [], []>} : vector<8x256xf32>, vector<256x128xf32>, vector<8x128xf32> -> vector<8x128xf32>
    %c0_82 = arith.constant 0 : index
    %c0_83 = arith.constant 0 : index
    %201 = vector.load %arg9[%c0_82, %c0_83] : memref<1x128xf32, #tpu.memory_space<vmem>>, vector<1x128xf32>
    %202 = vector.broadcast %201 : vector<1x128xf32> to vector<8x128xf32>
    %203 = arith.addf %200, %202 : vector<8x128xf32>
    %cst_84 = arith.constant 0.000000e+00 : f32
    %204 = vector.broadcast %cst_84 : f32 to vector<8x128xf32>
    %205 = arith.maximumf %203, %204 : vector<8x128xf32>
    %c0_85 = arith.constant 0 : index
    %c0_86 = arith.constant 0 : index
    %206 = vector.load %arg10[%c0_85, %c0_86] : memref<128x256xf32, #tpu.memory_space<vmem>>, vector<128x256xf32>
    %cst_87 = arith.constant dense<0.000000e+00> : vector<8x256xf32>
    %207 = tpu.matmul %205, %206, %cst_87 {dimension_numbers = #tpu.dot_dimension_numbers<[1], [0], [0], [1], [0, 0, 1, 1], [], []>} : vector<8x128xf32>, vector<128x256xf32>, vector<8x256xf32> -> vector<8x256xf32>
    %c0_88 = arith.constant 0 : index
    %c0_89 = arith.constant 0 : index
    %208 = vector.load %arg11[%c0_88, %c0_89] : memref<1x256xf32, #tpu.memory_space<vmem>>, vector<1x256xf32>
    %209 = vector.broadcast %208 : vector<1x256xf32> to vector<8x256xf32>
    %210 = arith.addf %207, %209 : vector<8x256xf32>
    %211 = arith.addf %210, %198 : vector<8x256xf32>
    %cst_90 = arith.constant dense<0.000000e+00> : vector<8xf32>
    %212 = vector.multi_reduction <add>, %211, %cst_90 [1] : vector<8x256xf32> to vector<8xf32>
    %213 = vector.shape_cast %212 : vector<8xf32> to vector<8x1xf32>
    %cst_91 = arith.constant 2.560000e+02 : f32
    %214 = vector.broadcast %cst_91 : f32 to vector<8x1xf32>
    %215 = arith.divf %213, %214 : vector<8x1xf32>
    %216 = vector.broadcast %215 : vector<8x1xf32> to vector<8x256xf32>
    %217 = arith.subf %211, %216 : vector<8x256xf32>
    %218 = arith.mulf %217, %217 : vector<8x256xf32>
    %cst_92 = arith.constant dense<0.000000e+00> : vector<8xf32>
    %219 = vector.multi_reduction <add>, %218, %cst_92 [1] : vector<8x256xf32> to vector<8xf32>
    %220 = vector.shape_cast %219 : vector<8xf32> to vector<8x1xf32>
    %cst_93 = arith.constant 2.560000e+02 : f32
    %221 = vector.broadcast %cst_93 : f32 to vector<8x1xf32>
    %222 = arith.divf %220, %221 : vector<8x1xf32>
    %cst_94 = arith.constant 9.99999974E-6 : f32
    %223 = vector.broadcast %cst_94 : f32 to vector<8x1xf32>
    %224 = arith.addf %222, %223 : vector<8x1xf32>
    %225 = math.rsqrt %224 : vector<8x1xf32>
    %226 = vector.broadcast %225 : vector<8x1xf32> to vector<8x256xf32>
    %227 = arith.mulf %217, %226 : vector<8x256xf32>
    %c0_95 = arith.constant 0 : index
    %c0_96 = arith.constant 0 : index
    %228 = vector.load %arg12[%c0_95, %c0_96] : memref<1x256xf32, #tpu.memory_space<vmem>>, vector<1x256xf32>
    %229 = vector.broadcast %228 : vector<1x256xf32> to vector<8x256xf32>
    %230 = arith.mulf %227, %229 : vector<8x256xf32>
    %c0_97 = arith.constant 0 : index
    %c0_98 = arith.constant 0 : index
    %231 = vector.load %arg13[%c0_97, %c0_98] : memref<1x256xf32, #tpu.memory_space<vmem>>, vector<1x256xf32>
    %232 = vector.broadcast %231 : vector<1x256xf32> to vector<8x256xf32>
    %233 = arith.addf %230, %232 : vector<8x256xf32>
    %c0_99 = arith.constant 0 : index
    %c0_100 = arith.constant 0 : index
    %234 = vector.load %arg14[%c0_99, %c0_100] : memref<8x256xf32, #tpu.memory_space<vmem>>, vector<8x256xf32>
    tpu.vector_store %arg14[%c0_99, %c0_100], %233 {strides = array<i32>} : memref<8x256xf32, #tpu.memory_space<vmem>>, vector<8x256xf32>,
    return
  }
  func.func @transform_0(%arg0: i32) -> (i32, i32) {
    %c0_i32 = arith.constant 0 : i32
    %c0_i32_0 = arith.constant 0 : i32
    return %c0_i32, %arg0 : i32, i32
  }
  func.func @transform_1(%arg0: i32) -> (i32, i32) {
    %c0_i32 = arith.constant 0 : i32
    %c0_i32_0 = arith.constant 0 : i32
    %c0_i32_1 = arith.constant 0 : i32
    return %c0_i32, %c0_i32_0 : i32, i32
  }
  func.func @transform_2(%arg0: i32) -> (i32, i32) {
    %c0_i32 = arith.constant 0 : i32
    %c0_i32_0 = arith.constant 0 : i32
    %c0_i32_1 = arith.constant 0 : i32
    return %c0_i32, %c0_i32_0 : i32, i32
  }
  func.func @transform_3(%arg0: i32) -> (i32, i32) {
    %c0_i32 = arith.constant 0 : i32
    %c0_i32_0 = arith.constant 0 : i32
    %c0_i32_1 = arith.constant 0 : i32
    return %c0_i32, %c0_i32_0 : i32, i32
  }
  func.func @transform_4(%arg0: i32) -> (i32, i32) {
    %c0_i32 = arith.constant 0 : i32
    %c0_i32_0 = arith.constant 0 : i32
    %c0_i32_1 = arith.constant 0 : i32
    return %c0_i32, %c0_i32_0 : i32, i32
  }
  func.func @transform_5(%arg0: i32) -> (i32, i32) {
    %c0_i32 = arith.constant 0 : i32
    %c0_i32_0 = arith.constant 0 : i32
    %c0_i32_1 = arith.constant 0 : i32
    return %c0_i32, %c0_i32_0 : i32, i32
  }
  func.func @transform_6(%arg0: i32) -> (i32, i32) {
    %c0_i32 = arith.constant 0 : i32
    %c0_i32_0 = arith.constant 0 : i32
    %c0_i32_1 = arith.constant 0 : i32
    return %c0_i32, %c0_i32_0 : i32, i32
  }
  func.func @transform_7(%arg0: i32) -> (i32, i32) {
    %c0_i32 = arith.constant 0 : i32
    %c0_i32_0 = arith.constant 0 : i32
    %c0_i32_1 = arith.constant 0 : i32
    return %c0_i32, %c0_i32_0 : i32, i32
  }
  func.func @transform_8(%arg0: i32) -> (i32, i32) {
    %c0_i32 = arith.constant 0 : i32
    %c0_i32_0 = arith.constant 0 : i32
    %c0_i32_1 = arith.constant 0 : i32
    return %c0_i32, %c0_i32_0 : i32, i32
  }
  func.func @transform_9(%arg0: i32) -> (i32, i32) {
    %c0_i32 = arith.constant 0 : i32
    %c0_i32_0 = arith.constant 0 : i32
    %c0_i32_1 = arith.constant 0 : i32
    return %c0_i32, %c0_i32_0 : i32, i32
  }
  func.func @transform_10(%arg0: i32) -> (i32, i32) {
    %c0_i32 = arith.constant 0 : i32
    %c0_i32_0 = arith.constant 0 : i32
    %c0_i32_1 = arith.constant 0 : i32
    return %c0_i32, %c0_i32_0 : i32, i32
  }
  func.func @transform_11(%arg0: i32) -> (i32, i32) {
    %c0_i32 = arith.constant 0 : i32
    %c0_i32_0 = arith.constant 0 : i32
    %c0_i32_1 = arith.constant 0 : i32
    return %c0_i32, %c0_i32_0 : i32, i32
  }
  func.func @transform_12(%arg0: i32) -> (i32, i32) {
    %c0_i32 = arith.constant 0 : i32
    %c0_i32_0 = arith.constant 0 : i32
    %c0_i32_1 = arith.constant 0 : i32
    return %c0_i32, %c0_i32_0 : i32, i32
  }
  func.func @transform_13(%arg0: i32) -> (i32, i32) {
    %c0_i32 = arith.constant 0 : i32
    %c0_i32_0 = arith.constant 0 : i32
    return %c0_i32, %arg0 : i32, i32
  }
  func.func @transform_14(%arg0: i32) -> (i32, i32, i32) {
    %c0_i32 = arith.constant 0 : i32
    %c0_i32_0 = arith.constant 0 : i32
    %c0_i32_1 = arith.constant 0 : i32
    return %arg0, %c0_i32, %c0_i32_0 : i32, i32, i32
  }
}

</mosaic_0001>

<bundles_post_ra>
// kernel: encoding_layer_forward.1
= control target key start
LH: loop header
LB: loop body
LE: loop exit
PB: predicated region body
PF: predicated region fallthrough
CT: control target
= control target key end

     0   :  { %s3317_s0 = inlined_call_operand.vmem [shape: f32[8,512], index: 0, kind: input, shape index: {}]   ;;  %s3318_s1 = inlined_call_operand.hbm [shape: f32[256,768], index: 1, kind: input, shape index: {}]   ;;  %s3319_s2 = inlined_call_operand.vmem [shape: f32[1,768], index: 2, kind: input, shape index: {}]   ;;  %s3320_s3 = inlined_call_operand.hbm [shape: f32[256,256], index: 3, kind: input, shape index: {}]   ;;  %s3321_s4 = inlined_call_operand.vmem [shape: f32[1,256], index: 4, kind: input, shape index: {}]   ;;  %s3322_s5 = inlined_call_operand.vmem [shape: f32[1,256], index: 5, kind: input, shape index: {}]   ;;  %s3323_s6 = inlined_call_operand.vmem [shape: f32[1,256], index: 6, kind: input, shape index: {}]   ;;  %s3324_s7 = inlined_call_operand.hbm [shape: f32[256,128], index: 7, kind: input, shape index: {}]   ;;  %s3325_s8 = inlined_call_operand.vmem [shape: f32[1,128], index: 8, kind: input, shape index: {}]   ;;  %s3326_s9 = inlined_call_operand.hbm [shape: f32[128,256], index: 9, kind: input, shape index: {}]   ;;  %s3327_s10 = inlined_call_operand.vmem [shape: f32[1,256], index: 10, kind: input, shape index: {}]   ;;  %s3328_s11 = inlined_call_operand.vmem [shape: f32[1,256], index: 11, kind: input, shape index: {}]   ;;  %s3329_s12 = inlined_call_operand.vmem [shape: f32[1,256], index: 12, kind: input, shape index: {}]   ;;  %s3330_s13 = inlined_call_operand.vmem [shape: f32[8,512], index: 13, kind: output, shape index: {0}]   ;;  %s3331_s14 = inlined_call_operand.hbm [shape: f32[2,8,8], index: 14, kind: output, shape index: {1}]  }
   0x1   :  { %3341 = sst [smem:[#allocation22_spill]] %s3318_s1 }
   0x2   :  { %3342 = sst [smem:[#allocation23_spill]] %s3320_s3 }
   0x3   :  { %3343 = sst [smem:[#allocation24_spill]] %s3328_s11 }
   0x4   :  { %3344 = sst [smem:[#allocation25_spill]] %s3329_s12 }
   0x5   :  { %3345 = sst [smem:[#allocation26_spill]] %s3330_s13 }
   0x6   :  { %3346 = sst [smem:[#allocation27_spill]] %s3331_s14 }
   0x7   :  { %20 = vsyncpa [#allocation3], 0 }
   0x8   :  { %21 = vsyncpa [#allocation6], 0 }
   0x9   :  { %22 = vsyncpa [#allocation9], 0 }
   0xa   :  { %23 = vsyncpa [#allocation4], 0 }
   0xb   :  { %25 = vsyncpa [#allocation4 + $0x1], 0  ;;  %s2932_s29 = smov 0   ;;  %s2934_s30 = smov 0  }
   0xc   :  { %s2936_s15 = smov 0   ;;  %s2938_s16 = smov 0  }
   0xd LB: > { %3347 = sst [smem:[#allocation15_spill]] %s2829_s29  ;;  %s2953_s17 = sadd.s32 4294967295, %s2841_s16   ;;  %s2841_s16 = sphi %s2938_s16, %s3368_s16   ;;  %s2837_s15 = sphi %s2936_s15, %s3370_s15   ;;  %s2833_s30 = sphi %s2934_s30, %s3372_s30   ;;  %s2829_s29 = sphi %s2932_s29, %s3371_s29  }
   0xe   : > { %3348 = sst [smem:[#allocation16_spill]] %s2837_s15  ;;  %s2455_s18 = sadd.s32 4294967294, %s2841_s16  }
   0xf   : > { %3349 = sst [smem:[#allocation17_spill]] %s2841_s16  ;;  %s2957_s19 = sadd.s32 1, %s2841_s16  }
  0x10   : > { %3350 = sst [smem:[#allocation18_spill]] %s2957_s19  ;;  %s342_s20 = sadd.s32 1, %s2837_s15 }
  0x11   : > { %s339_s21 = ssub.s32 %s2841_s16, %s2957_s19  ;;  %p352_p0 = scmp.ne.s32.totalorder %s2837_s15, %s2833_s30 }
  0x12   : > { %p340_p1 = scmp.eq.s32.totalorder %s339_s21, 0  ;;  %p353_p2 = scmp.eq.s32.totalorder %s2953_s17, 1 }
  0x13   : > { %p358_p3 = scmp.ne.s32.totalorder %s2833_s30, %s2829_s29  ;;  %p359_p4 = scmp.eq.s32.totalorder %s2455_s18, 1 }
  0x14   : > { %s2968_s22 = scalar_select %p340_p1, %s2837_s15, %s342_s20  }
  0x15   : > { %p2970_p5 = por %p353_p2, %p352_p0  ;;  %p2974_p6 = por %p359_p4, %p358_p3 }
  0x16   : > { %3351 = sst [smem:[#allocation19_spill]] %s2968_s22  ;;  %p2456_p7 = scmp.ge.s32.totalorder %s2841_s16, 1 }
  0x17   : > { %s3352_s23 = scalar_select %p2970_p5, 1, 0 }
  0x18   : > { %s3354_s24 = scalar_select %p2974_p6, 1, 0 }
  0x19   : > { %3353 = sst [smem:[#allocation20_spill]] %s3352_s23  ;;  %p366_p8 = scmp.lt.s32.totalorder %s2841_s16, 3 }
  0x1a   : > { %3355 = sst [smem:[#allocation21_spill]] %s3354_s24  ;;  %p2551_p9 = scmp.eq.s32.totalorder %s2953_s17, 0 }
  0x1b   : > { %p2981_p10 = pnand %p2456_p7, %p366_p8  ;;  %s3357_s3 = sld [smem:[#allocation23_spill]] }
  0x1c   : > { %s2843_s18 = smov [#allocation5]   ;;  %s3359_s1 = sld [smem:[#allocation22_spill]] }
  0x1d   : > { %p2534_p11 = pneg %p2981_p10  ;;  %s396_s20 = sshll.u32 %s2843_s18, 4  ;;  %s397_s20 = int_to_ptr.vmem [resolvable:$true] %s396_s20 }
  0x1e   : > { %s2844_s26 = smov 256   ;;  %s2845_s27 = smov 16  }
  0x1f   : > { %p2992_p12 = pnand %p2551_p9, %p2534_p11  ;;  %s2847_s24 = smov 768  }
  0x20   : > { %s2848_s29 = smov 48   ;;  %s417_s15 = sshll.u32 %s3324_s7, 4  ;;  %s418_s15 = int_to_ptr.hbm [resolvable:$true] %s417_s15 }
  0x21   : > { %s394_s28 = sshll.u32 %s3357_s3, 4  ;;  %s2846_s3 = smov [#allocation2]   ;;  %s395_s28 = int_to_ptr.hbm [resolvable:$true] %s394_s28 }
  0x22   : > { %s377_s19 = sshll.u32 %s3359_s1, 4  ;;  %s379_s18 = sshll.u32 %s2846_s3, 4  ;;  %s378_s19 = int_to_ptr.hbm [resolvable:$true] %s377_s19  ;;  %s380_s18 = int_to_ptr.vmem [resolvable:$true] %s379_s18 }
  0x23   : > { %2540 = dma.hbm_to_vmem [thread:$0]  (!%p2992_p12), %s395_s28, 8192, %s397_s20, [#allocation6], %s2844_s26, %s2844_s26, %s2845_s27  }
  0x24   : > { %2537 = dma.hbm_to_vmem [thread:$0]  (!%p2992_p12), %s378_s19, 24576, %s380_s18, [#allocation3], %s2847_s24, %s2847_s24, %s2848_s29  }
  0x25   : > { %s2849_s22 = smov [#allocation7]   ;;  %s434_s28 = sshll.u32 %s3326_s9, 4  ;;  %s435_s28 = int_to_ptr.hbm [resolvable:$true] %s434_s28 }
  0x26   : > { %s419_s1 = sshll.u32 %s2849_s22, 4  ;;  %s2850_s20 = smov 128   ;;  %s420_s1 = int_to_ptr.vmem [resolvable:$true] %s419_s1 }
  0x27   : > { %s2851_s3 = smov 8   ;;  %s2852_s14 = smov [#allocation8]  }
  0x28   : > { %2543 = dma.hbm_to_vmem [thread:$0]  (!%p2992_p12), %s418_s15, 4096, %s420_s1, [#allocation6], %s2850_s20, %s2850_s20, %s2851_s3  }
  0x29   : > { %s436_s23 = sshll.u32 %s2852_s14, 4  ;;  %470 = sbr.rel (%p2981_p10) target bundleno = 2422 (0x976), region = 72  ;;  %s437_s23 = int_to_ptr.vmem [resolvable:$true] %s436_s23 }
  0x2a   : > { %2546 = dma.hbm_to_vmem [thread:$0]  (!%p2992_p12), %s435_s28, 4096, %s437_s23, [#allocation9], %s2844_s26, %s2844_s26, %s2845_s27  }
  0x2e   : > { %2812 = dma.done.wait (%p2551_p9), [#allocation3], 24576  }
  0x2f   : > { %2814 = vsyncadd (%p2551_p9), [#allocation3], 4294942720 }
  0x30   : > { %2816 = dma.done.wait (%p2551_p9), [#allocation6], 12288  }
  0x31   : > { %2818 = vsyncadd (%p2551_p9), [#allocation6], 4294955008 }
  0x32   : > { %2820 = dma.done.wait (%p2551_p9), [#allocation9], 4096  }
  0x33   : > { %2822 = vsyncadd (%p2551_p9), [#allocation9], 4294963200  ;;  %v641_v0 = vld [vmem:[#allocation2 + $0x2d0] sm:$0xff]  ;;  %v635_v1 = vld [vmem:[#allocation2 + $0x2a0] sm:$0xff]  ;;  %s2468_s1 = sshll.u32 %s2953_s17, 1  ;;  %vm998_vm0 = vcmask 261120  }
  0x34   : > { %v737_v2 = vld [vmem:[#allocation2 + $0x5d0] sm:$0xff]  ;;  %757 = vmatpush.msra.mxu0 %v641_v0  ;;  %v731_v3 = vld [vmem:[#allocation2 + $0x5a0] sm:$0xff]  ;;  %p538_p13 = scmp.lt.s32.totalorder %s2468_s1, 3  ;;  %s2853_s19 = smov 96   ;;  %vm1025_vm1 = vcmask 64512  }
  0x35   : > { %777 = vmatpush.msra.mxu1 %v737_v2  ;;  %v629_v4 = vld [vmem:[#allocation2 + $0x270] sm:$0xff]  ;;  %v623_v6 = vld [vmem:[#allocation2 + $0x240] sm:$0xff]  ;;  %s2854_s23 = smov 64   ;;  %s2855_s24 = smov 32  }
  0x36   : > { %v725_v5 = vld [vmem:[#allocation2 + $0x570] sm:$0xff]  ;;  %758 = vmatpush.msra.mxu0 %v635_v1  ;;  %v719_v7 = vld [vmem:[#allocation2 + $0x540] sm:$0xff]  ;;  %s3374_s1 = smov (!%p538_p13, %s2468_s1), 3  ;;  %s534_s25 = sand.u32 1, %s2833_s30  }
  0x37   : > { %778 = vmatpush.msra.mxu1 %v731_v3  ;;  %v617_v8 = vld [vmem:[#allocation2 + $0x210] sm:$0xff]  ;;  %v611_v10 = vld [vmem:[#allocation2 + $0x1e0] sm:$0xff]  ;;  %s2469_s11 = sshll.u32 %s3374_s1, 3  ;;  %s3214_s21 = sshll.u32 %s534_s25, 3 }
  0x38   : > { %759 = vmatpush.msra.mxu0 %v629_v4  ;;  %v713_v9 = vld [vmem:[#allocation2 + $0x510] sm:$0xff]  ;;  %v707_v11 = vld [vmem:[#allocation2 + $0x4e0] sm:$0xff]  ;;  %s3036_s14 = scalar_lea.vmem %s3317_s0, %s2469_s11  ;;  %s536_s26 = scalar_lea.vmem [#allocation10], %s3214_s21 }
  0x39   : > { %779 = vmatpush.msra.mxu1 %v725_v5  ;;  %v605_v12 = vld [vmem:[#allocation2 + $0x1b0] sm:$0xff]  ;;  %v599_v14 = vld [vmem:[#allocation2 + $0x180] sm:$0xff]  ;;  %v3042_v35 = vld [vmem:[%s3036_s14 + $0x8] sm:$0xff]  ;;  %s2513_s16 = sshll.u32 %s2953_s17, 3  ;;  %s2327_s18 = sshll.u32 %s536_s26, 4  ;;  %s2328_s18 = int_to_ptr.vmem [resolvable:$true] %s2327_s18 }
  0x3a   : > { %760 = vmatpush.msra.mxu0 %v623_v6  ;;  %v701_v13 = vld [vmem:[#allocation2 + $0x4b0] sm:$0xff]  ;;  %v695_v15 = vld [vmem:[#allocation2 + $0x480] sm:$0xff]  ;;  %s2311_s22 = scalar_lea.sflag [#allocation4], %s534_s25 }
  0x3b   : > { %780 = vmatpush.msra.mxu1 %v719_v7  ;;  %v593_v16 = vld [vmem:[#allocation2 + $0x150] sm:$0xff]  ;;  %v587_v18 = vld [vmem:[#allocation2 + $0x120] sm:$0xff] }
  0x3c   : > { %761 = vmatpush.msra.mxu0 %v617_v8  ;;  %v689_v17 = vld [vmem:[#allocation2 + $0x450] sm:$0xff]  ;;  %v683_v19 = vld [vmem:[#allocation2 + $0x420] sm:$0xff] }
  0x3d   : > { %781 = vmatpush.msra.mxu1 %v713_v9  ;;  %v581_v20 = vld [vmem:[#allocation2 + $0xf0] sm:$0xff]  ;;  %v575_v22 = vld [vmem:[#allocation2 + $0xc0] sm:$0xff] }
  0x3e   : > { %762 = vmatpush.msra.mxu0 %v611_v10  ;;  %v677_v21 = vld [vmem:[#allocation2 + $0x3f0] sm:$0xff]  ;;  %v671_v23 = vld [vmem:[#allocation2 + $0x3c0] sm:$0xff] }
  0x3f   : > { %782 = vmatpush.msra.mxu1 %v707_v11  ;;  %v569_v24 = vld [vmem:[#allocation2 + $0x90] sm:$0xff]  ;;  %v563_v26 = vld [vmem:[#allocation2 + $0x60] sm:$0xff] }
  0x40   : > { %763 = vmatpush.msra.mxu0 %v605_v12  ;;  %v665_v25 = vld [vmem:[#allocation2 + $0x390] sm:$0xff]  ;;  %v659_v27 = vld [vmem:[#allocation2 + $0x360] sm:$0xff] }
  0x41   : > { %783 = vmatpush.msra.mxu1 %v701_v13  ;;  %v557_v28 = vld [vmem:[#allocation2 + $0x30] sm:$0xff]  ;;  %v551_v30 = vld [vmem:[#allocation2] sm:$0xff] }
  0x42   : > { %764 = vmatpush.msra.mxu0 %v599_v14  ;;  %v653_v29 = vld [vmem:[#allocation2 + $0x330] sm:$0xff]  ;;  %v647_v31 = vld [vmem:[#allocation2 + $0x300] sm:$0xff] }
  0x43   : > { %784 = vmatpush.msra.mxu1 %v695_v15  ;;  %v643_v32 = vld [vmem:[#allocation2 + $0x2e0] sm:$0xff]  ;;  %v637_v36 = vld [vmem:[#allocation2 + $0x2b0] sm:$0xff] }
  0x44   : > { %765 = vmatpush.msra.mxu0 %v593_v16  ;;  %v739_v33 = vld [vmem:[#allocation2 + $0x5e0] sm:$0xff]  ;;  %v733_v37 = vld [vmem:[#allocation2 + $0x5b0] sm:$0xff] }
  0x45   : > { %785 = vmatpush.msra.mxu1 %v689_v17  ;;  %v3039_v34 = vld [vmem:[%s3036_s14] sm:$0xff]  ;;  %v625_v40 = vld [vmem:[#allocation2 + $0x250] sm:$0xff] }
  0x46   : > { %766 = vmatpush.msra.mxu0 %v587_v18  ;;  %v631_v38 = vld [vmem:[#allocation2 + $0x280] sm:$0xff]  ;;  %v721_v41 = vld [vmem:[#allocation2 + $0x550] sm:$0xff] }
  0x47   : > { %786 = vmatpush.msra.mxu1 %v683_v19  ;;  %v727_v39 = vld [vmem:[#allocation2 + $0x580] sm:$0xff]  ;;  %v613_v44 = vld [vmem:[#allocation2 + $0x1f0] sm:$0xff] }
  0x48   : > { %767 = vmatpush.msra.mxu0 %v581_v20  ;;  %v619_v42 = vld [vmem:[#allocation2 + $0x220] sm:$0xff]  ;;  %v709_v45 = vld [vmem:[#allocation2 + $0x4f0] sm:$0xff] }
  0x49   : > { %787 = vmatpush.msra.mxu1 %v677_v21  ;;  %v715_v43 = vld [vmem:[#allocation2 + $0x520] sm:$0xff]  ;;  %v601_v48 = vld [vmem:[#allocation2 + $0x190] sm:$0xff] }
  0x4a   : > { %768 = vmatpush.msra.mxu0 %v575_v22  ;;  %v607_v46 = vld [vmem:[#allocation2 + $0x1c0] sm:$0xff]  ;;  %v697_v49 = vld [vmem:[#allocation2 + $0x490] sm:$0xff] }
  0x4b   : > { %788 = vmatpush.msra.mxu1 %v671_v23  ;;  %v703_v47 = vld [vmem:[#allocation2 + $0x4c0] sm:$0xff]  ;;  %v589_v52 = vld [vmem:[#allocation2 + $0x130] sm:$0xff] }
  0x4c   : > { %769 = vmatpush.msra.mxu0 %v569_v24  ;;  %v595_v50 = vld [vmem:[#allocation2 + $0x160] sm:$0xff]  ;;  %v685_v53 = vld [vmem:[#allocation2 + $0x430] sm:$0xff] }
  0x4d   : > { %789 = vmatpush.msra.mxu1 %v665_v25  ;;  %v691_v51 = vld [vmem:[#allocation2 + $0x460] sm:$0xff]  ;;  %v577_v56 = vld [vmem:[#allocation2 + $0xd0] sm:$0xff] }
  0x4e   : > { %770 = vmatpush.msra.mxu0 %v563_v26  ;;  %v583_v54 = vld [vmem:[#allocation2 + $0x100] sm:$0xff]  ;;  %v673_v57 = vld [vmem:[#allocation2 + $0x3d0] sm:$0xff] }
  0x4f   : > { %790 = vmatpush.msra.mxu1 %v659_v27  ;;  %v679_v55 = vld [vmem:[#allocation2 + $0x400] sm:$0xff]  ;;  %v565_v60 = vld [vmem:[#allocation2 + $0x70] sm:$0xff] }
  0x50   : > { %771 = vmatpush.msra.mxu0 %v557_v28  ;;  %v571_v58 = vld [vmem:[#allocation2 + $0xa0] sm:$0xff]  ;;  %v661_v61 = vld [vmem:[#allocation2 + $0x370] sm:$0xff] }
  0x51   : > { %791 = vmatpush.msra.mxu1 %v653_v29  ;;  %v667_v59 = vld [vmem:[#allocation2 + $0x3a0] sm:$0xff]  ;;  %v553_v0 = vld [vmem:[#allocation2 + $0x10] sm:$0xff] }
  0x52   : > { %772 = vmatpush.msra.mxu0 %v551_v30  ;;  %v559_v62 = vld [vmem:[#allocation2 + $0x40] sm:$0xff]  ;;  %v649_v1 = vld [vmem:[#allocation2 + $0x310] sm:$0xff] }
  0x53   : > { %792 = vmatpush.msra.mxu1 %v647_v31  ;;  %773 = vmatmul.f32.vlgmr.msra.gmra.mxu0 %v3039_v34  ;;  %v655_v63 = vld [vmem:[#allocation2 + $0x340] sm:$0xff]  ;;  %v645_v2 = vld [vmem:[#allocation2 + $0x2f0] sm:$0xff] }
  0x54   : > { %837 = vmatpush.msrb.mxu0 %v643_v32  ;;  %793 = vmatmul.f32.vlgmr.msra.gmra.mxu1 %v3042_v35  ;;  %v741_v3 = vld [vmem:[#allocation2 + $0x5f0] sm:$0xff]  ;;  %v639_v4 = vld [vmem:[#allocation2 + $0x2c0] sm:$0xff] }
  0x55   : > { %857 = vmatpush.msrb.mxu1 %v739_v33  ;;  %v735_v5 = vld [vmem:[#allocation2 + $0x5c0] sm:$0xff]  ;;  %v633_v6 = vld [vmem:[#allocation2 + $0x290] sm:$0xff] }
  0x56   : > { %838 = vmatpush.msrb.mxu0 %v637_v36  ;;  %v729_v7 = vld [vmem:[#allocation2 + $0x590] sm:$0xff]  ;;  %v627_v8 = vld [vmem:[#allocation2 + $0x260] sm:$0xff]  ;;  %v642_v36 = vld [vmem:[#allocation2 + $0x2d8] sm:$0xff] }
  0x57   : > { %858 = vmatpush.msrb.mxu1 %v733_v37  ;;  %v723_v9 = vld [vmem:[#allocation2 + $0x560] sm:$0xff]  ;;  %v621_v10 = vld [vmem:[#allocation2 + $0x230] sm:$0xff]  ;;  %v636_v37 = vld [vmem:[#allocation2 + $0x2a8] sm:$0xff]  ;;  %797 = vmatpush.msra.mxu2 %v642_v36 }
  0x58   : > { %839 = vmatpush.msrb.mxu0 %v631_v38  ;;  %v717_v11 = vld [vmem:[#allocation2 + $0x530] sm:$0xff]  ;;  %v615_v12 = vld [vmem:[#allocation2 + $0x200] sm:$0xff]  ;;  %v738_v38 = vld [vmem:[#allocation2 + $0x5d8] sm:$0xff] }
  0x59   : > { %859 = vmatpush.msrb.mxu1 %v727_v39  ;;  %v711_v13 = vld [vmem:[#allocation2 + $0x500] sm:$0xff]  ;;  %v609_v14 = vld [vmem:[#allocation2 + $0x1d0] sm:$0xff]  ;;  %817 = vmatpush.msra.mxu3 %v738_v38  ;;  %v602_v36 = vld [vmem:[#allocation2 + $0x198] sm:$0xff] }
  0x5a   : > { %840 = vmatpush.msrb.mxu0 %v625_v40  ;;  %v705_v15 = vld [vmem:[#allocation2 + $0x4d0] sm:$0xff]  ;;  %v603_v16 = vld [vmem:[#allocation2 + $0x1a0] sm:$0xff]  ;;  %798 = vmatpush.msra.mxu2 %v636_v37  ;;  %v704_v37 = vld [vmem:[#allocation2 + $0x4c8] sm:$0xff] }
  0x5b   : > { %860 = vmatpush.msrb.mxu1 %v721_v41  ;;  %v699_v17 = vld [vmem:[#allocation2 + $0x4a0] sm:$0xff]  ;;  %v597_v18 = vld [vmem:[#allocation2 + $0x170] sm:$0xff]  ;;  %v732_v41 = vld [vmem:[#allocation2 + $0x5a8] sm:$0xff] }
  0x5c   : > { %841 = vmatpush.msrb.mxu0 %v619_v42  ;;  %v693_v19 = vld [vmem:[#allocation2 + $0x470] sm:$0xff]  ;;  %v591_v20 = vld [vmem:[#allocation2 + $0x140] sm:$0xff]  ;;  %818 = vmatpush.msra.mxu3 %v732_v41  ;;  %v596_v38 = vld [vmem:[#allocation2 + $0x168] sm:$0xff] }
  0x5d   : > { %861 = vmatpush.msrb.mxu1 %v715_v43  ;;  %v687_v21 = vld [vmem:[#allocation2 + $0x440] sm:$0xff]  ;;  %v585_v22 = vld [vmem:[#allocation2 + $0x110] sm:$0xff]  ;;  %v630_v43 = vld [vmem:[#allocation2 + $0x278] sm:$0xff] }
  0x5e   : > { %842 = vmatpush.msrb.mxu0 %v613_v44  ;;  %v681_v23 = vld [vmem:[#allocation2 + $0x410] sm:$0xff]  ;;  %v579_v24 = vld [vmem:[#allocation2 + $0xe0] sm:$0xff]  ;;  %799 = vmatpush.msra.mxu2 %v630_v43  ;;  %v692_v41 = vld [vmem:[#allocation2 + $0x468] sm:$0xff] }
  0x5f   : > { %862 = vmatpush.msrb.mxu1 %v709_v45  ;;  %v675_v25 = vld [vmem:[#allocation2 + $0x3e0] sm:$0xff]  ;;  %v573_v26 = vld [vmem:[#allocation2 + $0xb0] sm:$0xff]  ;;  %v584_v43 = vld [vmem:[#allocation2 + $0x108] sm:$0xff] }
  0x60   : > { %843 = vmatpush.msrb.mxu0 %v607_v46  ;;  %v669_v27 = vld [vmem:[#allocation2 + $0x3b0] sm:$0xff]  ;;  %v567_v28 = vld [vmem:[#allocation2 + $0x80] sm:$0xff] }
  0x61   : > { %863 = vmatpush.msrb.mxu1 %v703_v47  ;;  %v663_v29 = vld [vmem:[#allocation2 + $0x380] sm:$0xff]  ;;  %v561_v30 = vld [vmem:[#allocation2 + $0x50] sm:$0xff] }
  0x62   : > { %844 = vmatpush.msrb.mxu0 %v601_v48  ;;  %v657_v31 = vld [vmem:[#allocation2 + $0x350] sm:$0xff]  ;;  %v555_v32 = vld [vmem:[#allocation2 + $0x20] sm:$0xff] }
  0x63   : > { %864 = vmatpush.msrb.mxu1 %v697_v49  ;;  %v651_v33 = vld [vmem:[#allocation2 + $0x320] sm:$0xff] }
  0x64   : > { %845 = vmatpush.msrb.mxu0 %v595_v50  ;;  %v3053_v42 = vld [vmem:[%s3319_s2] sm:$0x3f]  ;;  %v624_v50 = vld [vmem:[#allocation2 + $0x248] sm:$0xff] }
  0x65   : > { %865 = vmatpush.msrb.mxu1 %v691_v51  ;;  %v745_v44 = vperm.slane %v3053_v42, 0  ;;  %v747_v45 = vperm.slane %v3053_v42, 2  ;;  %v726_v51 = vld [vmem:[#allocation2 + $0x578] sm:$0xff]  ;;  %800 = vmatpush.msra.mxu2 %v624_v50  ;;  %v668_v50 = vld [vmem:[#allocation2 + $0x3a8] sm:$0xff] }
  0x66   : > { %846 = vmatpush.msrb.mxu0 %v589_v52  ;;  %819 = vmatpush.msra.mxu3 %v726_v51  ;;  %v560_v51 = vld [vmem:[#allocation2 + $0x48] sm:$0xff] }
  0x67   : > { %866 = vmatpush.msrb.mxu1 %v685_v53 }
  0x68   : > { %847 = vmatpush.msrb.mxu0 %v583_v54  ;;  %v618_v54 = vld [vmem:[#allocation2 + $0x218] sm:$0xff] }
  0x69   : > { %867 = vmatpush.msrb.mxu1 %v679_v55  ;;  %v720_v55 = vld [vmem:[#allocation2 + $0x548] sm:$0xff]  ;;  %801 = vmatpush.msra.mxu2 %v618_v54  ;;  %v554_v54 = vld [vmem:[#allocation2 + $0x18] sm:$0xff] }
  0x6a   : > { %848 = vmatpush.msrb.mxu0 %v577_v56  ;;  %820 = vmatpush.msra.mxu3 %v720_v55  ;;  %v612_v56 = vld [vmem:[#allocation2 + $0x1e8] sm:$0xff] }
  0x6b   : > { %868 = vmatpush.msrb.mxu1 %v673_v57  ;;  %v714_v57 = vld [vmem:[#allocation2 + $0x518] sm:$0xff]  ;;  %802 = vmatpush.msra.mxu2 %v612_v56  ;;  %v656_v55 = vld [vmem:[#allocation2 + $0x348] sm:$0xff] }
  0x6c   : > { %849 = vmatpush.msrb.mxu0 %v571_v58  ;;  %v606_v58 = vld [vmem:[#allocation2 + $0x1b8] sm:$0xff]  ;;  %821 = vmatpush.msra.mxu3 %v714_v57 }
  0x6d   : > { %869 = vmatpush.msrb.mxu1 %v667_v59  ;;  %803 = vmatpush.msra.mxu2 %v606_v58  ;;  %v646_v56 = vld [vmem:[#allocation2 + $0x2f8] sm:$0xff]  ;;  %v640_v58 = vld [vmem:[#allocation2 + $0x2c8] sm:$0xff] }
  0x6e   : > { %850 = vmatpush.msrb.mxu0 %v565_v60  ;;  %v708_v60 = vld [vmem:[#allocation2 + $0x4e8] sm:$0xff]  ;;  %v650_v57 = vld [vmem:[#allocation2 + $0x318] sm:$0xff] }
  0x6f   : > { %870 = vmatpush.msrb.mxu1 %v661_v61  ;;  %v600_v61 = vld [vmem:[#allocation2 + $0x188] sm:$0xff]  ;;  %822 = vmatpush.msra.mxu3 %v708_v60  ;;  %v742_v60 = vld [vmem:[#allocation2 + $0x5f8] sm:$0xff] }
  0x70   : > { %851 = vmatpush.msrb.mxu0 %v559_v62  ;;  %v702_v62 = vld [vmem:[#allocation2 + $0x4b8] sm:$0xff]  ;;  %804 = vmatpush.msra.mxu2 %v600_v61 }
  0x71   : > { %871 = vmatpush.msrb.mxu1 %v655_v63  ;;  %v594_v63 = vld [vmem:[#allocation2 + $0x158] sm:$0xff]  ;;  %823 = vmatpush.msra.mxu3 %v702_v62  ;;  %v628_v62 = vld [vmem:[#allocation2 + $0x268] sm:$0xff] }
  0x72   : > { %852 = vmatpush.msrb.mxu0 %v553_v0  ;;  %v696_v0 = vld [vmem:[#allocation2 + $0x488] sm:$0xff]  ;;  %805 = vmatpush.msra.mxu2 %v594_v63  ;;  %v634_v61 = vld [vmem:[#allocation2 + $0x298] sm:$0xff] }
  0x73   : > { %872 = vmatpush.msrb.mxu1 %v649_v1  ;;  %853 = vmatmul.f32.vlgmr.msrb.gmra.mxu0 %v3039_v34  ;;  %v588_v1 = vld [vmem:[#allocation2 + $0x128] sm:$0xff]  ;;  %v730_v63 = vld [vmem:[#allocation2 + $0x598] sm:$0xff] }
  0x74   : > { %873 = vmatmul.f32.vlgmr.msrb.gmra.mxu1 %v3042_v35  ;;  %917 = vmatpush.msra.mxu0 %v645_v2  ;;  %v690_v2 = vld [vmem:[#allocation2 + $0x458] sm:$0xff] }
  0x75   : > { %937 = vmatpush.msra.mxu1 %v741_v3  ;;  %824 = vmatpush.msra.mxu3 %v696_v0  ;;  %v582_v3 = vld [vmem:[#allocation2 + $0xf8] sm:$0xff] }
  0x76   : > { %918 = vmatpush.msra.mxu0 %v639_v4  ;;  %806 = vmatpush.msra.mxu2 %v588_v1  ;;  %v684_v4 = vld [vmem:[#allocation2 + $0x428] sm:$0xff]  ;;  %v622_v0 = vld [vmem:[#allocation2 + $0x238] sm:$0xff] }
  0x77   : > { %938 = vmatpush.msra.mxu1 %v735_v5  ;;  %825 = vmatpush.msra.mxu3 %v690_v2  ;;  %v576_v5 = vld [vmem:[#allocation2 + $0xc8] sm:$0xff] }
  0x78   : > { %919 = vmatpush.msra.mxu0 %v633_v6  ;;  %807 = vmatpush.msra.mxu2 %v582_v3  ;;  %v678_v6 = vld [vmem:[#allocation2 + $0x3f8] sm:$0xff]  ;;  %v724_v1 = vld [vmem:[#allocation2 + $0x568] sm:$0xff] }
  0x79   : > { %939 = vmatpush.msra.mxu1 %v729_v7  ;;  %826 = vmatpush.msra.mxu3 %v684_v4  ;;  %v570_v7 = vld [vmem:[#allocation2 + $0x98] sm:$0xff]  ;;  %v616_v2 = vld [vmem:[#allocation2 + $0x208] sm:$0xff] }
  0x7a   : > { %920 = vmatpush.msra.mxu0 %v627_v8  ;;  %808 = vmatpush.msra.mxu2 %v576_v5  ;;  %v672_v8 = vld [vmem:[#allocation2 + $0x3c8] sm:$0xff]  ;;  %v718_v3 = vld [vmem:[#allocation2 + $0x538] sm:$0xff] }
  0x7b   : > { %940 = vmatpush.msra.mxu1 %v723_v9  ;;  %827 = vmatpush.msra.mxu3 %v678_v6  ;;  %v564_v9 = vld [vmem:[#allocation2 + $0x68] sm:$0xff]  ;;  %v610_v4 = vld [vmem:[#allocation2 + $0x1d8] sm:$0xff] }
  0x7c   : > { %921 = vmatpush.msra.mxu0 %v621_v10  ;;  %809 = vmatpush.msra.mxu2 %v570_v7  ;;  %v666_v10 = vld [vmem:[#allocation2 + $0x398] sm:$0xff]  ;;  %v712_v5 = vld [vmem:[#allocation2 + $0x508] sm:$0xff] }
  0x7d   : > { %941 = vmatpush.msra.mxu1 %v717_v11  ;;  %828 = vmatpush.msra.mxu3 %v672_v8  ;;  %v558_v11 = vld [vmem:[#allocation2 + $0x38] sm:$0xff]  ;;  %v604_v6 = vld [vmem:[#allocation2 + $0x1a8] sm:$0xff] }
  0x7e   : > { %922 = vmatpush.msra.mxu0 %v615_v12  ;;  %810 = vmatpush.msra.mxu2 %v564_v9  ;;  %v660_v12 = vld [vmem:[#allocation2 + $0x368] sm:$0xff]  ;;  %v706_v7 = vld [vmem:[#allocation2 + $0x4d8] sm:$0xff] }
  0x7f   : > { %942 = vmatpush.msra.mxu1 %v711_v13  ;;  %829 = vmatpush.msra.mxu3 %v666_v10  ;;  %v552_v13 = vld [vmem:[#allocation2 + $0x8] sm:$0xff]  ;;  %v598_v8 = vld [vmem:[#allocation2 + $0x178] sm:$0xff] }
  0x80   : > { %923 = vmatpush.msra.mxu0 %v609_v14  ;;  %811 = vmatpush.msra.mxu2 %v558_v11  ;;  %v654_v14 = vld [vmem:[#allocation2 + $0x338] sm:$0xff]  ;;  %v700_v9 = vld [vmem:[#allocation2 + $0x4a8] sm:$0xff] }
  0x81   : > { %943 = vmatpush.msra.mxu1 %v705_v15  ;;  %v644_v15 = vld [vmem:[#allocation2 + $0x2e8] sm:$0xff]  ;;  %830 = vmatpush.msra.mxu3 %v660_v12  ;;  %v694_v11 = vld [vmem:[#allocation2 + $0x478] sm:$0xff] }
  0x82   : > { %924 = vmatpush.msra.mxu0 %v603_v16  ;;  %812 = vmatpush.msra.mxu2 %v552_v13  ;;  %v648_v16 = vld [vmem:[#allocation2 + $0x308] sm:$0xff]  ;;  %v586_v12 = vld [vmem:[#allocation2 + $0x118] sm:$0xff] }
  0x83   : > { %944 = vmatpush.msra.mxu1 %v699_v17  ;;  %v638_v17 = vld [vmem:[#allocation2 + $0x2b8] sm:$0xff]  ;;  %831 = vmatpush.msra.mxu3 %v654_v14  ;;  %v592_v10 = vld [vmem:[#allocation2 + $0x148] sm:$0xff] }
  0x84   : > { %925 = vmatpush.msra.mxu0 %v597_v18  ;;  %877 = vmatpush.msrb.mxu2 %v644_v15  ;;  %v740_v18 = vld [vmem:[#allocation2 + $0x5e8] sm:$0xff]  ;;  %v682_v15 = vld [vmem:[#allocation2 + $0x418] sm:$0xff] }
  0x85   : > { %945 = vmatpush.msra.mxu1 %v693_v19  ;;  %v632_v19 = vld [vmem:[#allocation2 + $0x288] sm:$0xff]  ;;  %813 = vmatmul.f32.vlgmr.msra.gmra.mxu2 %v3039_v34 }
  0x86   : > { %926 = vmatpush.msra.mxu0 %v591_v20  ;;  %v749_v20 = vperm.slane %v3053_v42, 4  ;;  %832 = vmatpush.msra.mxu3 %v648_v16  ;;  %v688_v13 = vld [vmem:[#allocation2 + $0x448] sm:$0xff]  ;;  %v574_v16 = vld [vmem:[#allocation2 + $0xb8] sm:$0xff] }
  0x87   : > { %946 = vmatpush.msra.mxu1 %v687_v21  ;;  %878 = vmatpush.msrb.mxu2 %v638_v17  ;;  %v734_v21 = vld [vmem:[#allocation2 + $0x5b8] sm:$0xff]  ;;  %v580_v14 = vld [vmem:[#allocation2 + $0xe8] sm:$0xff] }
  0x88   : > { %927 = vmatpush.msra.mxu0 %v585_v22  ;;  %897 = vmatpush.msrb.mxu3 %v740_v18  ;;  %v626_v22 = vld [vmem:[#allocation2 + $0x258] sm:$0xff]  ;;  %v676_v17 = vld [vmem:[#allocation2 + $0x3e8] sm:$0xff] }
  0x89   : > { %947 = vmatpush.msra.mxu1 %v681_v23  ;;  %879 = vmatpush.msrb.mxu2 %v632_v19  ;;  %v728_v23 = vld [vmem:[#allocation2 + $0x588] sm:$0xff]  ;;  %v670_v19 = vld [vmem:[#allocation2 + $0x3b8] sm:$0xff] }
  0x8a   : > { %928 = vmatpush.msra.mxu0 %v579_v24  ;;  %833 = vmatmul.f32.vlgmr.msra.gmra.mxu3 %v3042_v35  ;;  %v568_v18 = vld [vmem:[#allocation2 + $0x88] sm:$0xff] }
  0x8b   : > { %948 = vmatpush.msra.mxu1 %v675_v25  ;;  %898 = vmatpush.msrb.mxu3 %v734_v21  ;;  %v664_v21 = vld [vmem:[#allocation2 + $0x388] sm:$0xff] }
  0x8c   : > { %929 = vmatpush.msra.mxu0 %v573_v26  ;;  %v620_v26 = vld [vmem:[#allocation2 + $0x228] sm:$0xff]  ;;  %880 = vmatpush.msrb.mxu2 %v626_v22 }
  0x8d   : > { %949 = vmatpush.msra.mxu1 %v669_v27  ;;  %899 = vmatpush.msrb.mxu3 %v728_v23  ;;  %v556_v22 = vld [vmem:[#allocation2 + $0x28] sm:$0xff]  ;;  %v658_v23 = vld [vmem:[#allocation2 + $0x358] sm:$0xff] }
  0x8e   : > { %930 = vmatpush.msra.mxu0 %v567_v28  ;;  %v722_v28 = vld [vmem:[#allocation2 + $0x558] sm:$0xff]  ;;  %881 = vmatpush.msrb.mxu2 %v620_v26  ;;  %v1166_v26 = vld [vmem:[#allocation5 + $0x60] sm:$0xff] }
  0x8f   : > { %950 = vmatpush.msra.mxu1 %v663_v29  ;;  %v614_v29 = vld [vmem:[#allocation2 + $0x1f8] sm:$0xff]  ;;  %900 = vmatpush.msrb.mxu3 %v722_v28  ;;  %v1162_v28 = vld [vmem:[#allocation5 + $0x40] sm:$0xff] }
  0x90   : > { %931 = vmatpush.msra.mxu0 %v561_v30  ;;  %882 = vmatpush.msrb.mxu2 %v614_v29 }
  0x91   : > { %951 = vmatpush.msra.mxu1 %v657_v31  ;;  %v716_v31 = vld [vmem:[#allocation2 + $0x528] sm:$0xff] }
  0x92   : > { %932 = vmatpush.msra.mxu0 %v555_v32  ;;  %v608_v32 = vld [vmem:[#allocation2 + $0x1c8] sm:$0xff]  ;;  %901 = vmatpush.msrb.mxu3 %v716_v31 }
  0x93   : > { %952 = vmatpush.msra.mxu1 %v651_v33  ;;  %933 = vmatmul.f32.vlgmr.msra.gmra.mxu0 %v3039_v34  ;;  %v710_v33 = vld [vmem:[#allocation2 + $0x4f8] sm:$0xff] }
  0x94   : > { %953 = vmatmul.f32.vlgmr.msra.gmra.mxu1 %v3042_v35  ;;  %883 = vmatpush.msrb.mxu2 %v608_v32 }
  0x95   : > { %902 = vmatpush.msrb.mxu3 %v710_v33 }
  0x96   : > { %884 = vmatpush.msrb.mxu2 %v602_v36 }
  0x97   : > { %903 = vmatpush.msrb.mxu3 %v704_v37 }
  0x98   : > { %885 = vmatpush.msrb.mxu2 %v596_v38 }
  0xd0   : > { %v774_v39 = vpop.f32.mrf.mxu0 }
  0xd1   : > { %v794_v40 = vpop.f32.mrf.mxu1  ;;  %v775_v46 = vadd.f32 %v774_v39, %v745_v44  ;;  %v698_v39 = vld [vmem:[#allocation2 + $0x498] sm:$0xff] }
  0xd2   : > { %904 = vmatpush.msrb.mxu3 %v698_v39  ;;  %v686_v44 = vld [vmem:[#allocation2 + $0x438] sm:$0xff] }
  0xd3   : > { %v795_v52 = vadd.f32 %v794_v40, %v775_v46  ;;  %v590_v40 = vld [vmem:[#allocation2 + $0x138] sm:$0xff]  ;;  %v680_v46 = vld [vmem:[#allocation2 + $0x408] sm:$0xff] }
  0xd4   : > { %886 = vmatpush.msrb.mxu2 %v590_v40  ;;  %905 = vmatpush.msrb.mxu3 %v692_v41  ;;  %v748_v40 = vperm.slane %v3053_v42, 3 }
  0xd5   : > { %v3063_v59 = vmul.f32 0.17677669, %v795_v52  ;;  %v662_v52 = vld [vmem:[#allocation2 + $0x378] sm:$0xff] }
  0xd6   : > { %887 = vmatpush.msrb.mxu2 %v584_v43  ;;  %906 = vmatpush.msrb.mxu3 %v686_v44 }
  0xd8   : > { %907 = vmatpush.msrb.mxu3 %v680_v46 }
  0xf0   : > { %v854_v47 = vpop.f32.mrf.mxu0 }
  0xf1   : > { %v874_v48 = vpop.f32.mrf.mxu1  ;;  %v855_v49 = vadd.f32 %v854_v47, %v747_v45  ;;  %v578_v45 = vld [vmem:[#allocation2 + $0xd8] sm:$0xff]  ;;  %v572_v47 = vld [vmem:[#allocation2 + $0xa8] sm:$0xff] }
  0xf2   : > { %888 = vmatpush.msrb.mxu2 %v578_v45 }
  0xf3   : > { %v3057_v53 = vadd.f32 %v874_v48, %v855_v49  ;;  %v674_v48 = vld [vmem:[#allocation2 + $0x3d8] sm:$0xff] }
  0xf4   : > { %v566_v49 = vld [vmem:[#allocation2 + $0x78] sm:$0xff]  ;;  %889 = vmatpush.msrb.mxu2 %v572_v47  ;;  %908 = vmatpush.msrb.mxu3 %v674_v48 }
  0xf5   : > { %1084 = vrot.lane.b32.xlu0 %v3057_v53, %s2853_s19  ;;  %2472 = vmatpush.xpose.msk.msrb.mxu0 %vm998_vm0, %v3057_v53 }
  0xf6   : > { %890 = vmatpush.msrb.mxu2 %v566_v49  ;;  %909 = vmatpush.msrb.mxu3 %v668_v50 }
  0xf8   : > { %2473 = vmatmul.msk.f32.vlgmr.msrb.gmra.mxu0 %vm998_vm0, %v3063_v59  ;;  %891 = vmatpush.msrb.mxu2 %v560_v51 }
  0xf9   : > { %910 = vmatpush.msrb.mxu3 %v662_v52 }
  0xfa   : > { %892 = vmatpush.msrb.mxu2 %v554_v54 }
  0xfb   : > { %911 = vmatpush.msrb.mxu3 %v656_v55  ;;  %893 = vmatmul.f32.vlgmr.msrb.gmra.mxu2 %v3039_v34 }
  0xfc   : > { %957 = vmatpush.msra.mxu2 %v646_v56 }
  0xfd   : > { %1082 = vrot.lane.b32.xlu0 %v3063_v59, %s2853_s19  ;;  %912 = vmatpush.msrb.mxu3 %v650_v57 }
  0xfe   : > { %958 = vmatpush.msra.mxu2 %v640_v58  ;;  %913 = vmatmul.f32.vlgmr.msrb.gmra.mxu3 %v3042_v35 }
  0xff   : > { %977 = vmatpush.msra.mxu3 %v742_v60 }
 0x100   : > { %959 = vmatpush.msra.mxu2 %v634_v61 }
 0x102   : > { %960 = vmatpush.msra.mxu2 %v628_v62 }
 0x104   : > { %961 = vmatpush.msra.mxu2 %v622_v0 }
 0x105   : > { %1256 = vrot.lane.b32.xlu0 %v3063_v59, %s2854_s23 }
 0x106   : > { %962 = vmatpush.msra.mxu2 %v616_v2 }
 0x108   : > { %963 = vmatpush.msra.mxu2 %v610_v4  ;;  %v814_v33 = vpop.f32.mrf.mxu2 }
 0x10a   : > { %964 = vmatpush.msra.mxu2 %v604_v6 }
 0x10c   : > { %965 = vmatpush.msra.mxu2 %v598_v8 }
 0x10d   : > { %v834_v37 = vpop.f32.mrf.mxu3 }
 0x10e   : > { %966 = vmatpush.msra.mxu2 %v592_v10 }
 0x110   : > { %v934_v24 = vpop.f32.mrf.mxu0  ;;  %967 = vmatpush.msra.mxu2 %v586_v12 }
 0x111   : > { %v954_v25 = vpop.f32.mrf.mxu1  ;;  %v935_v27 = vadd.f32 %v934_v24, %v749_v20  ;;  %v562_v20 = vld [vmem:[#allocation2 + $0x58] sm:$0xff]  ;;  %v652_v24 = vld [vmem:[#allocation2 + $0x328] sm:$0xff] }
 0x112   : > { %968 = vmatpush.msra.mxu2 %v580_v14 }
 0x113   : > { %v3074_v30 = vadd.f32 %v954_v25, %v935_v27  ;;  %v1168_v25 = vld [vmem:[#allocation5 + $0x70] sm:$0xff] }
 0x114   : > { %969 = vmatpush.msra.mxu2 %v574_v16  ;;  %1185 = vmatpush.msra.mxu0 %v1168_v25  ;;  %v1164_v27 = vld [vmem:[#allocation5 + $0x50] sm:$0xff] }
 0x115   : > { %1136 = vrot.lane.b32.xlu2 %v3074_v30, %s2853_s19  ;;  %1069 = vmatpush.msrb.mxu1 %v3074_v30 }
 0x116   : > { %970 = vmatpush.msra.mxu2 %v568_v18  ;;  %1186 = vmatpush.msra.mxu0 %v1166_v26 }
 0x118   : > { %971 = vmatpush.msra.mxu2 %v562_v20  ;;  %1187 = vmatpush.msra.mxu0 %v1164_v27 }
 0x11a   : > { %972 = vmatpush.msra.mxu2 %v556_v22  ;;  %1188 = vmatpush.msra.mxu0 %v1162_v28 }
 0x11b   : > { %973 = vmatmul.f32.vlgmr.msra.gmra.mxu2 %v3039_v34 }
 0x11d   : > { %1258 = vrot.lane.b32.xlu2 %v3057_v53, %s2854_s23 }
 0x125   : > { %1388 = vrot.lane.b32.xlu2 %v3063_v59, %s2855_s24  ;;  %v736_v59 = vld [vmem:[#allocation2 + $0x5c8] sm:$0xff] }
 0x126   : > { %978 = vmatpush.msra.mxu3 %v736_v59 }
 0x128   : > { %979 = vmatpush.msra.mxu3 %v730_v63 }
 0x12a   : > { %980 = vmatpush.msra.mxu3 %v724_v1 }
 0x12c   : > { %981 = vmatpush.msra.mxu3 %v718_v3 }
 0x12e   : > { %982 = vmatpush.msra.mxu3 %v712_v5 }
 0x130   : > { %983 = vmatpush.msra.mxu3 %v706_v7 }
 0x132   : > { %984 = vmatpush.msra.mxu3 %v700_v9 }
 0x134   : > { %985 = vmatpush.msra.mxu3 %v694_v11 }
 0x136   : > { %986 = vmatpush.msra.mxu3 %v688_v13 }
 0x138   : > { %987 = vmatpush.msra.mxu3 %v682_v15 }
 0x13a   : > { %988 = vmatpush.msra.mxu3 %v676_v17 }
 0x13c   : > { %989 = vmatpush.msra.mxu3 %v670_v19 }
 0x13e   : > { %990 = vmatpush.msra.mxu3 %v664_v21 }
 0x140   : > { %991 = vmatpush.msra.mxu3 %v658_v23 }
 0x142   : > { %992 = vmatpush.msra.mxu3 %v652_v24 }
 0x143   : > { %993 = vmatmul.f32.vlgmr.msra.gmra.mxu3 %v3042_v35  ;;  %v746_v35 = vperm.slane %v3053_v42, 1 }
 0x145   : > { %v815_v36 = vadd.f32 %v814_v33, %v746_v35 }
 0x147   : > { %v835_v38 = vadd.f32 %v834_v37, %v815_v36 }
 0x149   : > { %v1520_v39 = vmul.f32 0.17677669, %v835_v38 }
 0x14b   : > { %1648 = vrot.lane.b32.xlu2 %v1520_v39, %s2853_s19 }
 0x153   : > { %1781 = vrot.lane.b32.xlu2 %v1520_v39, %s2854_s23 }
 0x15b   : > { %1913 = vrot.lane.b32.xlu2 %v1520_v39, %s2855_s24 }
 0x167   : > { %v1085_v29 = vpop.permute.xlu0 %1084 }
 0x168   : > { %2475 = vmatpush.xpose.msk.msrb.mxu2 %vm998_vm0, %v1085_v29 }
 0x16f   : > { %v1137_v31 = vpop.permute.xlu2 %1136  ;;  %v1083_v32 = vpop.permute.xlu0 %1082 }
 0x170   : > { %2476 = vmatmul.msk.f32.vlgmr.msrb.gmra.mxu2 %vm998_vm0, %v1083_v32  ;;  %1157 = vmatpush.msrb.mxu3 %v1137_v31 }
 0x175   : > { %v1022_v55 = vpop.f32.mrf.mxu0 }
 0x176   : > { %v1026_v56 = vsel %vm1025_vm1, %v1022_v55, -inf }
 0x177   : > { %v1259_v34 = vpop.permute.xlu2 %1258  ;;  %v1257_v7 = vpop.permute.xlu0 %1256 }
 0x178   : > { %2482 = vmatpush.xpose.msk.msrb.mxu0 %vm998_vm0, %v1259_v34 }
 0x17e   : > { %v894_v41 = vpop.f32.mrf.mxu2 }
 0x17f   : > { %v895_v43 = vadd.f32 %v894_v41, %v748_v40  ;;  %v1389_v9 = vpop.permute.xlu2 %1388 }
 0x181   : > { %v914_v44 = vpop.f32.mrf.mxu3 }
 0x182   : > { %v915_v45 = vadd.f32 %v914_v44, %v895_v43  ;;  %v1169_v43 = vld [vmem:[#allocation5 + $0x78] sm:$0xff]  ;;  %v1167_v44 = vld [vmem:[#allocation5 + $0x68] sm:$0xff] }
 0x183   : > { %1205 = vmatpush.msra.mxu1 %v1169_v43 }
 0x184   : > { %1650 = vrot.lane.b32.xlu0 %v915_v45, %s2853_s19 }
 0x185   : > { %1206 = vmatpush.msra.mxu1 %v1167_v44 }
 0x18c   : > { %1783 = vrot.lane.b32.xlu0 %v915_v45, %s2854_s23 }
 0x194   : > { %1915 = vrot.lane.b32.xlu0 %v915_v45, %s2855_s24 }
 0x19e   : > { %v3098_v46 = vpop.f32.mrf.mxu2 }
 0x1a5   : > { %v1649_v11 = vpop.permute.xlu2 %1648 }
 0x1ad   : > { %v1782_v13 = vpop.permute.xlu2 %1781 }
 0x1b5   : > { %v1914_v14 = vpop.permute.xlu2 %1913 }
 0x1c6   : > { %v3109_v4 = vpop.f32.mrf.mxu3 }
 0x1f3   : > { %v1107_v47 = vpop.f32.mrf.mxu2 }
 0x1f4   : > { %v1110_v48 = vsel %vm1025_vm1, %v1107_v47, -inf }
 0x1f5   : > { %1111 = vmax.xlane.f32.xlu1 %v1110_v48 }
 0x1f6   : > { %v1651_v8 = vpop.permute.xlu0 %1650 }
 0x1fe   : > { %v1784_v10 = vpop.permute.xlu0 %1783 }
 0x206   : > { %v1916_v12 = vpop.permute.xlu0 %1915 }
 0x268   : > { %v1112_v49 = vpop.xlane.xlu1 %1111 }
 0x269   : > { %v1113_v50 = vsub.f32 %v1107_v47, %v1112_v49  ;;  %v1163_v49 = vld [vmem:[#allocation5 + $0x48] sm:$0xff] }
 0x26b   : > { %v1114_v51 = vmul.f32 1.442695, %v1113_v50 }
 0x26d   : > { %2607 = vpow2.f32 %v1114_v51 }
 0x273   : > { %v2608_v52 = vpop.eup %2607 }
 0x274   : > { %v1116_v54 = vsel %vm1025_vm1, %v2608_v52, 0.0 }
 0x275   : > { %1117 = vadd.xlane.f32.xlu1 %v1116_v54 }
 0x28e   : > { %1390 = vrot.lane.b32.xlu1 %v3057_v53, %s2855_s24 }
 0x2b8   : > { %1027 = vmax.xlane.f32.xlu1 %v1026_v56 }
 0x2e8   : > { %v1118_v57 = vpop.xlane.xlu1 %1117 }
 0x2e9   : > { %2609 = vrcp.f32 %v1118_v57  ;;  %v1130_v59 = vand.u32 2147483648, %v1118_v57  ;;  %v1128_v63 = vand.u32 2147483647, %v1118_v57  ;;  %vm1124_vm3 = vweird.f32 %v1118_v57 }
 0x2eb   : > { %v1131_v1 = vor.u32 1.1754944e-38, %v1130_v59  ;;  %vm1129_vm5 = vcmp.eq.f32.partialorder %v1128_v63, 8.507059e+37  ;;  %v750_v59 = vperm.slane %v3053_v42, 5 }
 0x2ef   : > { %v2610_v58 = vpop.eup %2609 }
 0x2f0   : > { %v1120_v60 = vmul.f32 %v2610_v58, %v1118_v57  ;;  %vm1125_vm2 = vweird.f32 %v2610_v58 }
 0x2f1   : > { %vm1126_vm4 = vmor %vm1124_vm3, %vm1125_vm2 }
 0x2f2   : > { %v1121_v61 = vsub.f32 1.0, %v1120_v60 }
 0x2f4   : > { %v1122_v62 = vmul.f32 %v2610_v58, %v1121_v61 }
 0x2f6   : > { %v1123_v0 = vadd.f32 %v2610_v58, %v1122_v62 }
 0x2f8   : > { %v1127_v2 = vsel %vm1126_vm4, %v2610_v58, %v1123_v0 }
 0x2f9   : > { %v1132_v53 = vsel %vm1129_vm5, %v1131_v1, %v1127_v2 }
 0x2fa   : > { %v3105_v3 = vmul.f32 %v2608_v52, %v1132_v53  ;;  %v975_v53 = vadd.f32 %v3098_v46, %v750_v59 }
 0x2fc   : > { %2477 = vmatmul.msk.f32.vlgmr.msrb.gmra.mxu3 %vm1025_vm1, %v3105_v3 }
 0x300   : > { %v1391_v6 = vpop.permute.xlu1 %1390 }
 0x32b   : > { %v1028_v18 = vpop.xlane.xlu1 %1027 }
 0x32c   : > { %v1029_v19 = vsub.f32 %v1022_v55, %v1028_v18 }
 0x32e   : > { %v1030_v22 = vmul.f32 1.442695, %v1029_v19 }
 0x330   : > { %2611 = vpow2.f32 %v1030_v22 }
 0x336   : > { %v3131_v25 = vpop.eup %2611 }
 0x337   : > { %v1032_v28 = vsel %vm1025_vm1, %v3131_v25, 0.0 }
 0x37f   : > { %v3111_v5 = vpop.f32.mrf.mxu3 }
 0x380   : > { %2478 = vmatmul.msk.f32.vlgmr.msra.gmra.mxu0 %vm998_vm0, %v3111_v5 }
 0x381   : > { %2487 = vmatpush.xpose.msk.msra.mxu0 %vm998_vm0, %v1391_v6 }
 0x388   : > { %2483 = vmatmul.msk.f32.vlgmr.msrb.gmra.mxu0 %vm998_vm0, %v1257_v7 }
 0x389   : > { %2492 = vmatpush.xpose.msk.msrb.mxu0 %vm998_vm0, %v915_v45  ;;  %v1165_v45 = vld [vmem:[#allocation5 + $0x58] sm:$0xff] }
 0x38a   : > { %1207 = vmatpush.msra.mxu1 %v1165_v45 }
 0x38c   : > { %1208 = vmatpush.msra.mxu1 %v1163_v49 }
 0x390   : > { %2488 = vmatmul.msk.f32.vlgmr.msra.gmra.mxu0 %vm998_vm0, %v1389_v9 }
 0x391   : > { %2497 = vmatpush.xpose.msk.msra.mxu0 %vm998_vm0, %v1651_v8 }
 0x398   : > { %2493 = vmatmul.msk.f32.vlgmr.msrb.gmra.mxu0 %vm998_vm0, %v1520_v39 }
 0x399   : > { %2502 = vmatpush.xpose.msk.msrb.mxu0 %vm998_vm0, %v1784_v10 }
 0x3a0   : > { %2498 = vmatmul.msk.f32.vlgmr.msra.gmra.mxu0 %vm998_vm0, %v1649_v11  ;;  %v3162_v11 = vadd.f32 %v3109_v4, %v975_v53 }
 0x3a1   : > { %2507 = vmatpush.xpose.msk.msra.mxu0 %vm998_vm0, %v1916_v12 }
 0x3a8   : > { %2503 = vmatmul.msk.f32.vlgmr.msrb.gmra.mxu0 %vm998_vm0, %v1782_v13 }
 0x3b0   : > { %2508 = vmatmul.msk.f32.vlgmr.msra.gmra.mxu0 %vm998_vm0, %v1914_v14 }
 0x3fd   : > { %v3126_v15 = vpop.f32.mrf.mxu0 }
 0x405   : > { %v1281_v16 = vpop.f32.mrf.mxu0 }
 0x406   : > { %v1284_v17 = vsel %vm1025_vm1, %v1281_v16, -inf }
 0x407   : > { %1285 = vmax.xlane.f32.xlu0 %v1284_v17 }
 0x40d   : > { %v1413_v20 = vpop.f32.mrf.mxu0 }
 0x40e   : > { %v1416_v21 = vsel %vm1025_vm1, %v1413_v20, -inf }
 0x40f   : > { %1417 = vmax.xlane.f32.xlu2 %v1416_v21 }
 0x415   : > { %v1544_v23 = vpop.f32.mrf.mxu0 }
 0x416   : > { %v1547_v24 = vsel %vm1025_vm1, %v1544_v23, -inf }
 0x417   : > { %1548 = vmax.xlane.f32.xlu1 %v1547_v24  ;;  %v1081_v24 = vld [vmem:[#allocation5 + $0x38] sm:$0xff] }
 0x418   : > { %1248 = vmatpush.msra.mxu3 %v1081_v24 }
 0x41d   : > { %v1673_v26 = vpop.f32.mrf.mxu0 }
 0x41e   : > { %v1676_v27 = vsel %vm1025_vm1, %v1673_v26, -inf }
 0x41f   : > { %1677 = vmax.xlane.f32.xlu2 %v1676_v27  ;;  %1033 = vadd.xlane.f32.xlu1 %v1032_v28  ;;  %v1076_v27 = vld [vmem:[#allocation5 + $0x10] sm:$0xff]  ;;  %v1077_v28 = vld [vmem:[#allocation5 + $0x18] sm:$0xff] }
 0x425   : > { %v1806_v29 = vpop.f32.mrf.mxu0 }
 0x426   : > { %v1809_v31 = vsel %vm1025_vm1, %v1806_v29, -inf }
 0x427   : > { %1810 = vmax.xlane.f32.xlu0 %v1809_v31 }
 0x42d   : > { %v3137_v32 = vpop.f32.mrf.mxu0 }
 0x42e   : > { %v1941_v34 = vsel %vm1025_vm1, %v3137_v32, -inf }
 0x42f   : > { %1942 = vmax.xlane.f32.xlu2 %v1941_v34 }
 0x47a   : > { %v1286_v35 = vpop.xlane.xlu0 %1285 }
 0x47b   : > { %v1287_v33 = vsub.f32 %v1281_v16, %v1286_v35 }
 0x47d   : > { %v1288_v36 = vmul.f32 1.442695, %v1287_v33 }
 0x47f   : > { %2613 = vpow2.f32 %v1288_v36 }
 0x482   : > { %v1418_v37 = vpop.xlane.xlu2 %1417 }
 0x483   : > { %v1419_v38 = vsub.f32 %v1413_v20, %v1418_v37 }
 0x485   : > { %v3141_v39 = vpop.eup %2613  ;;  %v1420_v40 = vmul.f32 1.442695, %v1419_v38 }
 0x486   : > { %v1290_v41 = vsel %vm1025_vm1, %v3141_v39, 0.0 }
 0x487   : > { %2615 = vpow2.f32 %v1420_v40  ;;  %1291 = vadd.xlane.f32.xlu0 %v1290_v41 }
 0x48a   : > { %v1549_v47 = vpop.xlane.xlu1 %1548 }
 0x48b   : > { %v1550_v48 = vsub.f32 %v1544_v23, %v1549_v47  ;;  %v1080_v23 = vld [vmem:[#allocation5 + $0x30] sm:$0xff] }
 0x48c   : > { %1228 = vmatpush.msra.mxu2 %v1080_v23 }
 0x48d   : > { %v3145_v50 = vpop.eup %2615  ;;  %v1551_v51 = vmul.f32 1.442695, %v1550_v48 }
 0x48e   : > { %v1422_v52 = vsel %vm1025_vm1, %v3145_v50, 0.0 }
 0x48f   : > { %2617 = vpow2.f32 %v1551_v51  ;;  %1423 = vadd.xlane.f32.xlu1 %v1422_v52 }
 0x492   : > { %v1678_v54 = vpop.xlane.xlu2 %1677  ;;  %v1034_v55 = vpop.xlane.xlu1 %1033 }
 0x493   : > { %v1679_v56 = vsub.f32 %v1673_v26, %v1678_v54  ;;  %2619 = vrcp.f32 %v1034_v55  ;;  %v1046_v6 = vand.u32 2147483648, %v1034_v55  ;;  %v1044_v9 = vand.u32 2147483647, %v1034_v55  ;;  %v1079_v26 = vld [vmem:[#allocation5 + $0x28] sm:$0xff] }
 0x494   : > { %vm1040_vm7 = vweird.f32 %v1034_v55  ;;  %1249 = vmatpush.msra.mxu3 %v1079_v26 }
 0x495   : > { %v3149_v57 = vpop.eup %2617  ;;  %v1680_v58 = vmul.f32 1.442695, %v1679_v56  ;;  %v1047_v12 = vor.u32 1.1754944e-38, %v1046_v6  ;;  %vm1045_vm9 = vcmp.eq.f32.partialorder %v1044_v9, 8.507059e+37 }
 0x496   : > { %v1553_v60 = vsel %vm1025_vm1, %v3149_v57, 0.0  ;;  %1250 = vmatpush.msra.mxu3 %v1077_v28  ;;  %v1341_v28 = vld [vmem:[#allocation5 + $0xb0] sm:$0xff] }
 0x497   : > { %2621 = vpow2.f32 %v1680_v58  ;;  %1554 = vadd.xlane.f32.xlu2 %v1553_v60 }
 0x499   : > { %v2620_v61 = vpop.eup %2619 }
 0x49a   : > { %v1036_v62 = vmul.f32 %v2620_v61, %v1034_v55  ;;  %v1811_v63 = vpop.xlane.xlu0 %1810  ;;  %vm1041_vm6 = vweird.f32 %v2620_v61 }
 0x49b   : > { %v1812_v0 = vsub.f32 %v1806_v29, %v1811_v63  ;;  %1309 = vrot.lane.b32.xlu0 %v3074_v30, %s2854_s23  ;;  %vm1042_vm8 = vmor %vm1040_vm7, %vm1041_vm6 }
 0x49c   : > { %v1037_v1 = vsub.f32 1.0, %v1036_v62 }
 0x49d   : > { %v3156_v2 = vpop.eup %2621  ;;  %v1813_v7 = vmul.f32 1.442695, %v1812_v0 }
 0x49e   : > { %v1038_v8 = vmul.f32 %v2620_v61, %v1037_v1  ;;  %v1682_v10 = vsel %vm1025_vm1, %v3156_v2, 0.0 }
 0x49f   : > { %2623 = vpow2.f32 %v1813_v7  ;;  %1683 = vadd.xlane.f32.xlu1 %v1682_v10 }
 0x4a0   : > { %v1039_v42 = vadd.f32 %v2620_v61, %v1038_v8 }
 0x4a2   : > { %v1043_v13 = vsel %vm1042_vm8, %v2620_v61, %v1039_v42  ;;  %v1943_v46 = vpop.xlane.xlu2 %1942 }
 0x4a3   : > { %v1048_v14 = vsel %vm1045_vm9, %v1047_v12, %v1043_v13  ;;  %v1944_v16 = vsub.f32 %v3137_v32, %v1943_v46  ;;  %1702 = vrot.lane.b32.xlu0 %v3162_v11, %s2853_s19  ;;  %v1075_v32 = vld [vmem:[#allocation5 + $0x8] sm:$0xff] }
 0x4a4   : > { %v3168_v17 = vmul.f32 %v3131_v25, %v1048_v14  ;;  %v1078_v25 = vld [vmem:[#allocation5 + $0x20] sm:$0xff]  ;;  %1251 = vmatpush.msra.mxu3 %v1075_v32 }
 0x4a5   : > { %v3170_v18 = vpop.eup %2623  ;;  %v1945_v19 = vmul.f32 1.442695, %v1944_v16  ;;  %1229 = vmatpush.msra.mxu2 %v1078_v25 }
 0x4a6   : > { %2474 = vmatmul.msk.f32.vlgmr.msrb.gmra.mxu1 %vm1025_vm1, %v3168_v17  ;;  %v1815_v4 = vsel %vm1025_vm1, %v3170_v18, 0.0 }
 0x4a7   : > { %2625 = vpow2.f32 %v1945_v19  ;;  %1816 = vadd.xlane.f32.xlu1 %v1815_v4  ;;  %1230 = vmatpush.msra.mxu2 %v1076_v27 }
 0x4ab   : > { %1966 = vrot.lane.b32.xlu0 %v3162_v11, %s2855_s24 }
 0x4ad   : > { %v3178_v20 = vpop.eup %2625 }
 0x4ae   : > { %2479 = vmatmul.msk.f32.vlgmr.msra.gmra.mxu1 %vm998_vm0, %v3111_v5  ;;  %v1947_v21 = vsel %vm1025_vm1, %v3178_v20, 0.0 }
 0x4af   : > { %1948 = vadd.xlane.f32.xlu1 %v1947_v21  ;;  %1441 = vrot.lane.b32.xlu2 %v3074_v30, %s2855_s24  ;;  %v1074_v30 = vld [vmem:[#allocation5] sm:$0xff]  ;;  %s3361_s24 = sld [smem:[#allocation27_spill]] }
 0x4b0   : > { %1231 = vmatpush.msra.mxu2 %v1074_v30  ;;  %v1340_v30 = vld [vmem:[#allocation5 + $0xa8] sm:$0xff] }
 0x4b2   : > { %1358 = vmatpush.msrb.mxu2 %v1341_v28  ;;  %v1729_v28 = vld [vmem:[#allocation5 + $0x148] sm:$0xff] }
 0x4b5   : > { %s2325_s27 = scalar_lea.hbm %s3361_s24, %s2513_s16  ;;  %s2787_s12 = scalar_lea.hbm %s3361_s24, 16 }
 0x4b6   : > { %s2329_s15 = sshll.u32 %s2325_s27, 4  ;;  %s2330_s15 = int_to_ptr.hbm [resolvable:$true] %s2329_s15 }
 0x4b7   : > { %s2781_s28 = sshra.s32 %s2330_s15, 4  ;;  %s2782_s28 = int_to_ptr.hbm [resolvable:$true] %s2781_s28 }
 0x4b8   : > { %s2783_s20 = scalar_lea.hbm %s2782_s28, 8  ;;  %p2788_p3 = scmp.lt.s32.totalorder %s2782_s28, %s3361_s24 }
 0x4b9   : > { %p2784_p0 = scmp.ne.s32.totalorder %s2782_s28, %s2783_s20  ;;  %p2789_p4 = scmp.lt.s32.totalorder %s2787_s12, %s2783_s20 }
 0x4bb   : > { %p2785_p1 = pnand %p2784_p0, %p2970_p5  ;;  %p2790_p7 = por %p2789_p4, %p2788_p3 }
 0x4bd   : > { %p2786_p2 = pneg %p2785_p1 }
 0x4bf   : > { %p2791_p8 = pnand %p2790_p7, %p2786_p2 }
 0x4c8   : > { %1834 = vrot.lane.b32.xlu1 %v3162_v11, %s2854_s23 }
 0x4fa   : > { %v1292_v22 = vpop.xlane.xlu0 %1291 }
 0x4fb   : > { %2627 = vrcp.f32 %v1292_v22  ;;  %v1304_v35 = vand.u32 2147483648, %v1292_v22  ;;  %v1302_v36 = vand.u32 2147483647, %v1292_v22  ;;  %vm1298_vm11 = vweird.f32 %v1292_v22 }
 0x4fd   : > { %v1305_v40 = vor.u32 1.1754944e-38, %v1304_v35  ;;  %vm1303_vm13 = vcmp.eq.f32.partialorder %v1302_v36, 8.507059e+37 }
 0x501   : > { %v2628_v5 = vpop.eup %2627 }
 0x502   : > { %v1294_v29 = vmul.f32 %v2628_v5, %v1292_v22  ;;  %v1424_v31 = vpop.xlane.xlu1 %1423  ;;  %vm1299_vm10 = vweird.f32 %v2628_v5 }
 0x503   : > { %2629 = vrcp.f32 %v1424_v31  ;;  %vm1300_vm12 = vmor %vm1298_vm11, %vm1299_vm10  ;;  %v1436_v49 = vand.u32 2147483648, %v1424_v31  ;;  %v1434_v54 = vand.u32 2147483647, %v1424_v31  ;;  %vm1430_vm15 = vweird.f32 %v1424_v31 }
 0x504   : > { %v1295_v34 = vsub.f32 1.0, %v1294_v29  ;;  %v1342_v29 = vld [vmem:[#allocation5 + $0xb8] sm:$0xff] }
 0x505   : > { %v1437_v58 = vor.u32 1.1754944e-38, %v1436_v49  ;;  %vm1435_vm3 = vcmp.eq.f32.partialorder %v1434_v54, 8.507059e+37  ;;  %1378 = vmatpush.msrb.mxu3 %v1342_v29  ;;  %v1866_v29 = vld [vmem:[#allocation5 + $0x1b0] sm:$0xff] }
 0x506   : > { %v1296_v33 = vmul.f32 %v2628_v5, %v1295_v34  ;;  %v1337_v34 = vld [vmem:[#allocation5 + $0x90] sm:$0xff] }
 0x507   : > { %1379 = vmatpush.msrb.mxu3 %v1340_v30 }
 0x508   : > { %v1297_v37 = vadd.f32 %v2628_v5, %v1296_v33  ;;  %v1338_v33 = vld [vmem:[#allocation5 + $0x98] sm:$0xff] }
 0x509   : > { %v2630_v38 = vpop.eup %2629  ;;  %1380 = vmatpush.msrb.mxu3 %v1338_v33  ;;  %v1863_v33 = vld [vmem:[#allocation5 + $0x198] sm:$0xff] }
 0x50a   : > { %v1301_v41 = vsel %vm1300_vm12, %v2628_v5, %v1297_v37  ;;  %v1426_v43 = vmul.f32 %v2630_v38, %v1424_v31  ;;  %v1555_v44 = vpop.xlane.xlu2 %1554  ;;  %vm1431_vm14 = vweird.f32 %v2630_v38  ;;  %v1339_v31 = vld [vmem:[#allocation5 + $0xa0] sm:$0xff] }
 0x50b   : > { %v1306_v45 = vsel %vm1303_vm13, %v1305_v40, %v1301_v41  ;;  %2631 = vrcp.f32 %v1555_v44  ;;  %vm1432_vm2 = vmor %vm1430_vm15, %vm1431_vm14  ;;  %v1567_v1 = vand.u32 2147483648, %v1555_v44  ;;  %v1565_v7 = vand.u32 2147483647, %v1555_v44  ;;  %1359 = vmatpush.msrb.mxu2 %v1339_v31  ;;  %v1867_v31 = vld [vmem:[#allocation5 + $0x1b8] sm:$0xff] }
 0x50c   : > { %v1427_v47 = vsub.f32 1.0, %v1426_v43  ;;  %v3189_v48 = vmul.f32 %v3141_v39, %v1306_v45  ;;  %vm1561_vm5 = vweird.f32 %v1555_v44 }
 0x50d   : > { %v1310_v51 = vpop.permute.xlu0 %1309  ;;  %v1568_v10 = vor.u32 1.1754944e-38, %v1567_v1  ;;  %vm1566_vm7 = vcmp.eq.f32.partialorder %v1565_v7, 8.507059e+37  ;;  %1360 = vmatpush.msrb.mxu2 %v1337_v34  ;;  %v1473_v1 = vld [vmem:[#allocation5 + $0xf0] sm:$0xff]  ;;  %v1472_v7 = vld [vmem:[#allocation5 + $0xe8] sm:$0xff] }
 0x50e   : > { %v1428_v52 = vmul.f32 %v2630_v38, %v1427_v47  ;;  %1330 = vmatpush.msrb.mxu1 %v1310_v51  ;;  %v1865_v34 = vld [vmem:[#allocation5 + $0x1a8] sm:$0xff] }
 0x50f   : > { %2484 = vmatmul.msk.f32.vlgmr.msrb.gmra.mxu1 %vm1025_vm1, %v3189_v48 }
 0x510   : > { %v1429_v55 = vadd.f32 %v2630_v38, %v1428_v52 }
 0x511   : > { %v2632_v56 = vpop.eup %2631 }
 0x512   : > { %v1433_v60 = vsel %vm1432_vm2, %v2630_v38, %v1429_v55  ;;  %v1557_v61 = vmul.f32 %v2632_v56, %v1555_v44  ;;  %v1442_v59 = vpop.permute.xlu2 %1441  ;;  %v1684_v39 = vpop.xlane.xlu1 %1683  ;;  %vm1562_vm4 = vweird.f32 %v2632_v56 }
 0x513   : > { %v1438_v62 = vsel %vm1435_vm3, %v1437_v58, %v1433_v60  ;;  %2633 = vrcp.f32 %v1684_v39  ;;  %1462 = vmatpush.msra.mxu1 %v1442_v59  ;;  %vm1563_vm6 = vmor %vm1561_vm5, %vm1562_vm4  ;;  %v1696_v14 = vand.u32 2147483648, %v1684_v39  ;;  %v1694_v19 = vand.u32 2147483647, %v1684_v39 }
 0x514   : > { %v1558_v63 = vsub.f32 1.0, %v1557_v61  ;;  %v3195_v0 = vmul.f32 %v3145_v50, %v1438_v62  ;;  %vm1690_vm9 = vweird.f32 %v1684_v39 }
 0x515   : > { %1590 = vmatpush.msrb.mxu1 %v3162_v11  ;;  %v1703_v53 = vpop.permute.xlu0 %1702  ;;  %v1697_v22 = vor.u32 1.1754944e-38, %v1696_v14  ;;  %vm1695_vm11 = vcmp.eq.f32.partialorder %v1694_v19, 8.507059e+37  ;;  %v1600_v14 = vld [vmem:[#allocation5 + $0x128] sm:$0xff]  ;;  %v1598_v19 = vld [vmem:[#allocation5 + $0x118] sm:$0xff] }
 0x516   : > { %v1559_v6 = vmul.f32 %v2632_v56, %v1558_v63 }
 0x517   : > { %2489 = vmatmul.msk.f32.vlgmr.msra.gmra.mxu1 %vm1025_vm1, %v3195_v0 }
 0x518   : > { %v1560_v8 = vadd.f32 %v2632_v56, %v1559_v6  ;;  %1723 = vmatpush.msra.mxu1 %v1703_v53  ;;  %v1474_v53 = vld [vmem:[#allocation5 + $0xf8] sm:$0xff]  ;;  %v1471_v6 = vld [vmem:[#allocation5 + $0xe0] sm:$0xff] }
 0x519   : > { %v2634_v9 = vpop.eup %2633 }
 0x51a   : > { %v1564_v42 = vsel %vm1563_vm6, %v2632_v56, %v1560_v8  ;;  %v1686_v11 = vmul.f32 %v2634_v9, %v1684_v39  ;;  %v1817_v12 = vpop.xlane.xlu1 %1816  ;;  %vm1691_vm8 = vweird.f32 %v2634_v9  ;;  %v1469_v8 = vld [vmem:[#allocation5 + $0xd0] sm:$0xff] }
 0x51b   : > { %v1569_v50 = vsel %vm1566_vm7, %v1568_v10, %v1564_v42  ;;  %2635 = vrcp.f32 %v1817_v12  ;;  %vm1692_vm10 = vmor %vm1690_vm9, %vm1691_vm8  ;;  %v1829_v35 = vand.u32 2147483648, %v1817_v12  ;;  %vm1823_vm13 = vweird.f32 %v1817_v12  ;;  %v1467_v10 = vld [vmem:[#allocation5 + $0xc0] sm:$0xff]  ;;  %v1468_v42 = vld [vmem:[#allocation5 + $0xc8] sm:$0xff] }
 0x51c   : > { %v1687_v13 = vsub.f32 1.0, %v1686_v11  ;;  %v1570_v46 = vmul.f32 %v3149_v57, %v1569_v50  ;;  %v1827_v37 = vand.u32 2147483647, %v1817_v12  ;;  %v1602_v50 = vld [vmem:[#allocation5 + $0x138] sm:$0xff] }
 0x51d   : > { %v1830_v43 = vor.u32 1.1754944e-38, %v1829_v35  ;;  %v1862_v35 = vld [vmem:[#allocation5 + $0x190] sm:$0xff] }
 0x51e   : > { %v1688_v16 = vmul.f32 %v2634_v9, %v1687_v13  ;;  %vm1828_vm15 = vcmp.eq.f32.partialorder %v1827_v37, 8.507059e+37  ;;  %v1861_v37 = vld [vmem:[#allocation5 + $0x188] sm:$0xff] }
 0x51f   : > { %2494 = vmatmul.msk.f32.vlgmr.msrb.gmra.mxu1 %vm1025_vm1, %v1570_v46 }
 0x520   : > { %v1689_v4 = vadd.f32 %v2634_v9, %v1688_v16  ;;  %v1597_v16 = vld [vmem:[#allocation5 + $0x110] sm:$0xff] }
 0x521   : > { %v2636_v21 = vpop.eup %2635 }
 0x522   : > { %v1693_v23 = vsel %vm1692_vm10, %v2634_v9, %v1689_v4  ;;  %v1819_v24 = vmul.f32 %v2636_v21, %v1817_v12  ;;  %v1949_v25 = vpop.xlane.xlu1 %1948  ;;  %vm1824_vm12 = vweird.f32 %v2636_v21  ;;  %v1470_v9 = vld [vmem:[#allocation5 + $0xd8] sm:$0xff]  ;;  %v1601_v12 = vld [vmem:[#allocation5 + $0x130] sm:$0xff]  ;;  %v1595_v4 = vld [vmem:[#allocation5 + $0x100] sm:$0xff] }
 0x523   : > { %v1698_v26 = vsel %vm1695_vm11, %v1697_v22, %v1693_v23  ;;  %2637 = vrcp.f32 %v1949_v25  ;;  %v1071_v5 = vpop.f32.mrf.mxu1  ;;  %vm1825_vm14 = vmor %vm1823_vm13, %vm1824_vm12  ;;  %v1961_v49 = vand.u32 2147483648, %v1949_v25  ;;  %v1959_v54 = vand.u32 2147483647, %v1949_v25  ;;  %v1734_v22 = vld [vmem:[#allocation5 + $0x170] sm:$0xff]  ;;  %v1735_v23 = vld [vmem:[#allocation5 + $0x178] sm:$0xff] }
 0x524   : > { %v1820_v27 = vsub.f32 1.0, %v1819_v24  ;;  %2480 = vmatmul.msk.f32.vlgmr.msra.gmra.mxu2 %vm998_vm0, %v1071_v5  ;;  %2481 = vmatmul.msk.f32.vlgmr.msra.gmra.mxu3 %vm998_vm0, %v1071_v5  ;;  %v1699_v57 = vmul.f32 %v3156_v2, %v1698_v26  ;;  %v1134_v2 = vadd.f32 %v3105_v3, %v3168_v17  ;;  %vm1955_vm3 = vweird.f32 %v1949_v25  ;;  %v1733_v26 = vld [vmem:[#allocation5 + $0x168] sm:$0xff]  ;;  %v1730_v5 = vld [vmem:[#allocation5 + $0x150] sm:$0xff] }
 0x525   : > { %v1962_v17 = vor.u32 1.1754944e-38, %v1961_v49  ;;  %vm1960_vm5 = vcmp.eq.f32.partialorder %v1959_v54, 8.507059e+37  ;;  %v1993_v49 = vld [vmem:[#allocation5 + $0x1c8] sm:$0xff] }
 0x526   : > { %v1821_v32 = vmul.f32 %v2636_v21, %v1820_v27  ;;  %v1308_v44 = vadd.f32 %v3189_v48, %v1134_v2  ;;  %v1731_v27 = vld [vmem:[#allocation5 + $0x158] sm:$0xff] }
 0x527   : > { %2499 = vmatmul.msk.f32.vlgmr.msra.gmra.mxu1 %vm1025_vm1, %v1699_v57  ;;  %v1999_v2 = vld [vmem:[#allocation5 + $0x1f8] sm:$0xff] }
 0x528   : > { %v1822_v36 = vadd.f32 %v2636_v21, %v1821_v32  ;;  %v1440_v51 = vadd.f32 %v3195_v0, %v1308_v44  ;;  %v1336_v0 = vld [vmem:[#allocation5 + $0x88] sm:$0xff]  ;;  %v1864_v32 = vld [vmem:[#allocation5 + $0x1a0] sm:$0xff]  ;;  %v1994_v44 = vld [vmem:[#allocation5 + $0x1d0] sm:$0xff] }
 0x529   : > { %v2638_v38 = vpop.eup %2637  ;;  %1381 = vmatpush.msrb.mxu3 %v1336_v0 }
 0x52a   : > { %v1826_v40 = vsel %vm1825_vm14, %v2636_v21, %v1822_v36  ;;  %v1951_v41 = vmul.f32 %v2638_v38, %v1949_v25  ;;  %vm1956_vm2 = vweird.f32 %v2638_v38  ;;  %v1571_v55 = vadd.f32 %v1570_v46, %v1440_v51  ;;  %v1599_v46 = vld [vmem:[#allocation5 + $0x120] sm:$0xff]  ;;  %v1596_v21 = vld [vmem:[#allocation5 + $0x108] sm:$0xff] }
 0x52b   : > { %v1831_v47 = vsel %vm1828_vm15, %v1830_v43, %v1826_v40  ;;  %vm1957_vm4 = vmor %vm1955_vm3, %vm1956_vm2  ;;  %1510 = vmatpush.msra.mxu3 %v1474_v53  ;;  %v3222_v11 = vpop.f32.mrf.mxu1  ;;  %v1732_v25 = vld [vmem:[#allocation5 + $0x160] sm:$0xff]  ;;  %v1997_v43 = vld [vmem:[#allocation5 + $0x1e8] sm:$0xff] }
 0x52c   : > { %v1952_v45 = vsub.f32 1.0, %v1951_v41  ;;  %v1832_v3 = vmul.f32 %v3170_v18, %v1831_v47  ;;  %v1700_v48 = vadd.f32 %v1699_v57, %v1571_v55  ;;  %v1967_v18 = vpop.permute.xlu0 %1966  ;;  %v1728_v57 = vld [vmem:[#allocation5 + $0x140] sm:$0xff] }
 0x52d   : > { %1511 = vmatpush.msra.mxu3 %v1472_v7  ;;  %v1860_v36 = vld [vmem:[#allocation5 + $0x180] sm:$0xff] }
 0x52e   : > { %v1953_v52 = vmul.f32 %v2638_v38, %v1952_v45  ;;  %v1833_v61 = vadd.f32 %v1832_v3, %v1700_v48  ;;  %v1996_v41 = vld [vmem:[#allocation5 + $0x1e0] sm:$0xff]  ;;  %v1995_v45 = vld [vmem:[#allocation5 + $0x1d8] sm:$0xff] }
 0x52f   : > { %1512 = vmatpush.msra.mxu3 %v1470_v9  ;;  %v1992_v47 = vld [vmem:[#allocation5 + $0x1c0] sm:$0xff] }
 0x530   : > { %v1954_v56 = vadd.f32 %v2638_v38, %v1953_v52 }
 0x531   : > { %1513 = vmatpush.msra.mxu3 %v1468_v42 }
 0x532   : > { %v1958_v58 = vsel %vm1957_vm4, %v2638_v38, %v1954_v56  ;;  %v1998_v38 = vld [vmem:[#allocation5 + $0x1f0] sm:$0xff] }
 0x533   : > { %v1963_v60 = vsel %vm1960_vm5, %v1962_v17, %v1958_v58 }
 0x534   : > { %v1964_v59 = vmul.f32 %v3178_v20, %v1963_v60  ;;  %v1335_v20 = vld [vmem:[#allocation5 + $0x80] sm:$0xff] }
 0x535   : > { %1361 = vmatpush.msrb.mxu2 %v1335_v20 }
 0x536   : > { %v1965_v39 = vadd.f32 %v1964_v59, %v1833_v61 }
 0x537   : > { %1490 = vmatpush.msra.mxu2 %v1473_v1 }
 0x538   : > { %v2045_v62 = vmul.f32 0.125, %v1965_v39 }
 0x539   : > { %1491 = vmatpush.msra.mxu2 %v1471_v6 }
 0x53a   : > { %v1835_v63 = vpop.permute.xlu1 %1834  ;;  %2046 = vst.msk [vmem:[%s536_s26] sm:$0xff] %vm1025_vm1, %v2045_v62 }
 0x53b   : > { %1855 = vmatpush.msrb.mxu1 %v1835_v63  ;;  %1492 = vmatpush.msra.mxu2 %v1469_v8  ;;  %v2047_v8 = vld [vmem:[%s3321_s4] sm:$0x3] }
 0x53c   : > { %2504 = vmatmul.msk.f32.vlgmr.msrb.gmra.mxu1 %vm1025_vm1, %v1832_v3 }
 0x53d   : > { %1987 = vmatpush.msra.mxu1 %v1967_v18  ;;  %1493 = vmatpush.msra.mxu2 %v1467_v10 }
 0x544   : > { %2509 = vmatmul.msk.f32.vlgmr.msra.gmra.mxu1 %vm1025_vm1, %v1964_v59 }
 0x58c   : > { %v1332_v13 = vpop.f32.mrf.mxu1 }
 0x58d   : > { %2485 = vmatmul.msk.f32.vlgmr.msrb.gmra.mxu2 %vm998_vm0, %v1332_v13  ;;  %2486 = vmatmul.msk.f32.vlgmr.msrb.gmra.mxu3 %vm998_vm0, %v1332_v13 }
 0x58e   : > { %1618 = vmatpush.msrb.mxu2 %v1601_v12  ;;  %1638 = vmatpush.msrb.mxu3 %v1602_v50  ;;  %v2049_v12 = vperm.slane %v2047_v8, 0 }
 0x590   : > { %1619 = vmatpush.msrb.mxu2 %v1599_v46  ;;  %1639 = vmatpush.msrb.mxu3 %v1600_v14 }
 0x592   : > { %1620 = vmatpush.msrb.mxu2 %v1597_v16  ;;  %1640 = vmatpush.msrb.mxu3 %v1598_v19 }
 0x594   : > { %v1464_v24 = vpop.f32.mrf.mxu1  ;;  %1621 = vmatpush.msrb.mxu2 %v1595_v4  ;;  %1641 = vmatpush.msrb.mxu3 %v1596_v21  ;;  %v2645_v4 = vld [vmem:[%s3036_s14] sm:$0xff] }
 0x595   : > { %2490 = vmatmul.msk.f32.vlgmr.msra.gmra.mxu2 %vm998_vm0, %v1464_v24  ;;  %2491 = vmatmul.msk.f32.vlgmr.msra.gmra.mxu3 %vm998_vm0, %v1464_v24 }
 0x596   : > { %1751 = vmatpush.msra.mxu2 %v1734_v22  ;;  %1771 = vmatpush.msra.mxu3 %v1735_v23  ;;  %v2646_v22 = vld [vmem:[%s3036_s14 + $0x8] sm:$0xff] }
 0x598   : > { %1752 = vmatpush.msra.mxu2 %v1732_v25  ;;  %1772 = vmatpush.msra.mxu3 %v1733_v26  ;;  %v2856_v25 = vmov 256.0   ;;  %v2120_v26 = vld [vmem:[#allocation7 + $0x78] sm:$0xff] }
 0x599   : > { %2639 = vrcp.f32 %v2856_v25  ;;  %2141 = vmatpush.msrb.mxu0 %v2120_v26  ;;  %v2199_v25 = vld [vmem:[#allocation8 + $0x88] sm:$0xff] }
 0x59a   : > { %1753 = vmatpush.msra.mxu2 %v1730_v5  ;;  %1773 = vmatpush.msra.mxu3 %v1731_v27  ;;  %v2136_v5 = vld [vmem:[#allocation7 + $0xf8] sm:$0xff]  ;;  %v2119_v27 = vld [vmem:[#allocation7 + $0x70] sm:$0xff] }
 0x59b   : > { %2161 = vmatpush.msrb.mxu1 %v2136_v5  ;;  %2142 = vmatpush.msrb.mxu0 %v2119_v27  ;;  %v2196_v5 = vld [vmem:[#allocation8 + $0x70] sm:$0xff]  ;;  %v2197_v27 = vld [vmem:[#allocation8 + $0x78] sm:$0xff] }
 0x59c   : > { %v1592_v30 = vpop.f32.mrf.mxu1  ;;  %1754 = vmatpush.msra.mxu2 %v1728_v57  ;;  %1774 = vmatpush.msra.mxu3 %v1729_v28  ;;  %v2135_v57 = vld [vmem:[#allocation7 + $0xf0] sm:$0xff] }
 0x59d   : > { %2495 = vmatmul.msk.f32.vlgmr.msrb.gmra.mxu2 %vm998_vm0, %v1592_v30  ;;  %2496 = vmatmul.msk.f32.vlgmr.msrb.gmra.mxu3 %vm998_vm0, %v1592_v30 }
 0x59e   : > { %1883 = vmatpush.msrb.mxu2 %v1866_v29  ;;  %1903 = vmatpush.msrb.mxu3 %v1867_v31 }
 0x59f   : > { %v2640_v28 = vpop.eup %2639  ;;  %2162 = vmatpush.msrb.mxu1 %v2135_v57 }
 0x5a0   : > { %1884 = vmatpush.msrb.mxu2 %v1864_v32  ;;  %1904 = vmatpush.msrb.mxu3 %v1865_v34  ;;  %v2061_v29 = vmul.f32 256.0, %v2640_v28 }
 0x5a2   : > { %1885 = vmatpush.msrb.mxu2 %v1862_v35  ;;  %1905 = vmatpush.msrb.mxu3 %v1863_v33  ;;  %v2062_v31 = vsub.f32 1.0, %v2061_v29  ;;  %v2195_v29 = vld [vmem:[#allocation8 + $0x68] sm:$0xff] }
 0x5a4   : > { %v1725_v40 = vpop.f32.mrf.mxu1  ;;  %1886 = vmatpush.msrb.mxu2 %v1860_v36  ;;  %1906 = vmatpush.msrb.mxu3 %v1861_v37  ;;  %v2063_v30 = vmul.f32 %v2640_v28, %v2062_v31 }
 0x5a5   : > { %2500 = vmatmul.msk.f32.vlgmr.msra.gmra.mxu2 %vm998_vm0, %v1725_v40  ;;  %2501 = vmatmul.msk.f32.vlgmr.msra.gmra.mxu3 %vm998_vm0, %v1725_v40 }
 0x5a6   : > { %2015 = vmatpush.msra.mxu2 %v1998_v38  ;;  %2035 = vmatpush.msra.mxu3 %v1999_v2  ;;  %v2064_v32 = vadd.f32 %v2640_v28, %v2063_v30  ;;  %v2192_v30 = vld [vmem:[#allocation8 + $0x50] sm:$0xff] }
 0x5a7   : > { %v1233_v54 = vpop.f32.mrf.mxu2  ;;  %v1253_v55 = vpop.f32.mrf.mxu3 }
 0x5a8   : > { %2016 = vmatpush.msra.mxu2 %v1996_v41  ;;  %2036 = vmatpush.msra.mxu3 %v1997_v43  ;;  %v1234_v39 = vadd.f32 %v1233_v54, %v3126_v15  ;;  %v1254_v62 = vadd.f32 %v1253_v55, %v3222_v11  ;;  %v2050_v11 = vperm.slane %v2047_v8, 1  ;;  %v2118_v41 = vld [vmem:[#allocation7 + $0x68] sm:$0xff]  ;;  %v2212_v8 = vld [vmem:[#allocation8 + $0xf0] sm:$0xff] }
 0x5a9   : > { %v2134_v43 = vld [vmem:[#allocation7 + $0xe8] sm:$0xff]  ;;  %2143 = vmatpush.msrb.mxu0 %v2118_v41 }
 0x5aa   : > { %2017 = vmatpush.msra.mxu2 %v1994_v44  ;;  %2037 = vmatpush.msra.mxu3 %v1995_v45  ;;  %v2117_v44 = vld [vmem:[#allocation7 + $0x60] sm:$0xff]  ;;  %v2114_v54 = vld [vmem:[#allocation7 + $0x48] sm:$0xff] }
 0x5ab   : > { %2163 = vmatpush.msrb.mxu1 %v2134_v43  ;;  %v2133_v45 = vld [vmem:[#allocation7 + $0xe0] sm:$0xff]  ;;  %2144 = vmatpush.msrb.mxu0 %v2117_v44  ;;  %v2130_v55 = vld [vmem:[#allocation7 + $0xc8] sm:$0xff] }
 0x5ac   : > { %2018 = vmatpush.msra.mxu2 %v1992_v47  ;;  %2038 = vmatpush.msra.mxu3 %v1993_v49  ;;  %v2116_v47 = vld [vmem:[#allocation7 + $0x58] sm:$0xff]  ;;  %v2097_v43 = vld [vmem:[%s3323_s6] sm:$0x3] }
 0x5ad   : > { %2164 = vmatpush.msrb.mxu1 %v2133_v45  ;;  %v2132_v49 = vld [vmem:[#allocation7 + $0xd8] sm:$0xff]  ;;  %2145 = vmatpush.msrb.mxu0 %v2116_v47 }
 0x5af   : > { %2165 = vmatpush.msrb.mxu1 %v2132_v49 }
 0x5b9   : > { %v1857_v51 = vpop.f32.mrf.mxu1 }
 0x5ba   : > { %2505 = vmatmul.msk.f32.vlgmr.msrb.gmra.mxu2 %vm998_vm0, %v1857_v51  ;;  %2506 = vmatmul.msk.f32.vlgmr.msrb.gmra.mxu3 %vm998_vm0, %v1857_v51  ;;  %v2115_v51 = vld [vmem:[#allocation7 + $0x50] sm:$0xff] }
 0x5bb   : > { %2146 = vmatpush.msrb.mxu0 %v2115_v51  ;;  %2220 = vmatpush.msrb.mxu2 %v2212_v8 }
 0x5bd   : > { %2147 = vmatpush.msrb.mxu0 %v2114_v54  ;;  %v2100_v54 = vperm.slane %v2097_v43, 1 }
 0x5c1   : > { %v1989_v52 = vpop.f32.mrf.mxu1 }
 0x5c2   : > { %2510 = vmatmul.msk.f32.vlgmr.msra.gmra.mxu2 %vm998_vm0, %v1989_v52  ;;  %2511 = vmatmul.msk.f32.vlgmr.msra.gmra.mxu3 %vm998_vm0, %v1989_v52  ;;  %vm2065_vm0 = vweird.f32 %v2640_v28  ;;  %v2131_v52 = vld [vmem:[#allocation7 + $0xd0] sm:$0xff] }
 0x5c3   : > { %v3243_v34 = vsel %vm2065_vm0, %v2640_v28, %v2064_v32  ;;  %2166 = vmatpush.msrb.mxu1 %v2131_v52  ;;  %v2194_v28 = vld [vmem:[#allocation8 + $0x60] sm:$0xff]  ;;  %v2193_v32 = vld [vmem:[#allocation8 + $0x58] sm:$0xff]  ;;  %v2099_v52 = vperm.slane %v2097_v43, 0 }
 0x5c5   : > { %2167 = vmatpush.msrb.mxu1 %v2130_v55 }
 0x610   : > { %v1363_v56 = vpop.f32.mrf.mxu2  ;;  %v1383_v3 = vpop.f32.mrf.mxu3 }
 0x611   : > { %v1386_v63 = vadd.f32 %v1363_v56, %v1234_v39  ;;  %v1387_v18 = vadd.f32 %v1383_v3, %v1254_v62  ;;  %v2113_v56 = vld [vmem:[#allocation7 + $0x40] sm:$0xff] }
 0x612   : > { %v2129_v3 = vld [vmem:[#allocation7 + $0xc0] sm:$0xff]  ;;  %2148 = vmatpush.msrb.mxu0 %v2113_v56 }
 0x613   : > { %2168 = vmatpush.msrb.mxu1 %v2129_v3  ;;  %v2109_v39 = vld [vmem:[#allocation7 + $0x20] sm:$0xff] }
 0x614   : > { %v2125_v62 = vld [vmem:[#allocation7 + $0xa0] sm:$0xff] }
 0x618   : > { %v1495_v17 = vpop.f32.mrf.mxu2  ;;  %v1515_v58 = vpop.f32.mrf.mxu3 }
 0x619   : > { %v1518_v1 = vadd.f32 %v1495_v17, %v1386_v63  ;;  %v1519_v53 = vadd.f32 %v1515_v58, %v1387_v18  ;;  %v2112_v17 = vld [vmem:[#allocation7 + $0x38] sm:$0xff] }
 0x61a   : > { %v2128_v58 = vld [vmem:[#allocation7 + $0xb8] sm:$0xff]  ;;  %2149 = vmatpush.msrb.mxu0 %v2112_v17 }
 0x61b   : > { %2169 = vmatpush.msrb.mxu1 %v2128_v58  ;;  %v2108_v63 = vld [vmem:[#allocation7 + $0x18] sm:$0xff]  ;;  %v2188_v58 = vld [vmem:[#allocation8 + $0x30] sm:$0xff] }
 0x61c   : > { %v2124_v18 = vld [vmem:[#allocation7 + $0x98] sm:$0xff] }
 0x620   : > { %v1623_v48 = vpop.f32.mrf.mxu2  ;;  %v1643_v60 = vpop.f32.mrf.mxu3 }
 0x621   : > { %v1646_v6 = vadd.f32 %v1623_v48, %v1518_v1  ;;  %v1647_v7 = vadd.f32 %v1643_v60, %v1519_v53  ;;  %v2111_v48 = vld [vmem:[#allocation7 + $0x30] sm:$0xff]  ;;  %v2106_v1 = vld [vmem:[#allocation7 + $0x8] sm:$0xff] }
 0x622   : > { %v2127_v60 = vld [vmem:[#allocation7 + $0xb0] sm:$0xff]  ;;  %2150 = vmatpush.msrb.mxu0 %v2111_v48  ;;  %v2122_v53 = vld [vmem:[#allocation7 + $0x88] sm:$0xff]  ;;  %v2189_v48 = vld [vmem:[#allocation8 + $0x38] sm:$0xff] }
 0x623   : > { %2170 = vmatpush.msrb.mxu1 %v2127_v60  ;;  %v2186_v60 = vld [vmem:[#allocation8 + $0x20] sm:$0xff] }
 0x628   : > { %v1756_v61 = vpop.f32.mrf.mxu2  ;;  %v1776_v59 = vpop.f32.mrf.mxu3 }
 0x629   : > { %v1779_v9 = vadd.f32 %v1756_v61, %v1646_v6  ;;  %v1780_v10 = vadd.f32 %v1776_v59, %v1647_v7  ;;  %v2110_v61 = vld [vmem:[#allocation7 + $0x28] sm:$0xff]  ;;  %v2105_v6 = vld [vmem:[#allocation7] sm:$0xff] }
 0x62a   : > { %v2126_v59 = vld [vmem:[#allocation7 + $0xa8] sm:$0xff]  ;;  %2151 = vmatpush.msrb.mxu0 %v2110_v61  ;;  %v2121_v7 = vld [vmem:[#allocation7 + $0x80] sm:$0xff] }
 0x62b   : > { %2171 = vmatpush.msrb.mxu1 %v2126_v59  ;;  %v2187_v61 = vld [vmem:[#allocation8 + $0x28] sm:$0xff]  ;;  %v2184_v59 = vld [vmem:[#allocation8 + $0x10] sm:$0xff] }
 0x62c   : > { %2152 = vmatpush.msrb.mxu0 %v2109_v39  ;;  %v2183_v39 = vld [vmem:[#allocation8 + $0x8] sm:$0xff] }
 0x62d   : > { %2172 = vmatpush.msrb.mxu1 %v2125_v62  ;;  %v2606_v62 = vld [vmem:[%s3325_s8] ss:$0 sm:$0xff] }
 0x62e   : > { %2153 = vmatpush.msrb.mxu0 %v2108_v63 }
 0x62f   : > { %2173 = vmatpush.msrb.mxu1 %v2124_v18 }
 0x63d   : > { %v1888_v20 = vpop.f32.mrf.mxu2  ;;  %v1908_v0 = vpop.f32.mrf.mxu3 }
 0x63e   : > { %v1911_v42 = vadd.f32 %v1888_v20, %v1779_v9  ;;  %v1912_v15 = vadd.f32 %v1908_v0, %v1780_v10  ;;  %v2107_v20 = vld [vmem:[#allocation7 + $0x10] sm:$0xff]  ;;  %v2213_v9 = vld [vmem:[#allocation8 + $0xf8] sm:$0xff]  ;;  %v2210_v10 = vld [vmem:[#allocation8 + $0xe0] sm:$0xff] }
 0x63f   : > { %v2123_v0 = vld [vmem:[#allocation7 + $0x90] sm:$0xff]  ;;  %2154 = vmatpush.msrb.mxu0 %v2107_v20  ;;  %2240 = vmatpush.msrb.mxu3 %v2213_v9 }
 0x640   : > { %2174 = vmatpush.msrb.mxu1 %v2123_v0  ;;  %2221 = vmatpush.msrb.mxu2 %v2210_v10 }
 0x641   : > { %2155 = vmatpush.msrb.mxu0 %v2106_v1 }
 0x642   : > { %2175 = vmatpush.msrb.mxu1 %v2122_v53  ;;  %v2214_v53 = vld [vmem:[%s3327_s10] sm:$0x3] }
 0x643   : > { %2156 = vmatpush.msrb.mxu0 %v2105_v6  ;;  %v2216_v6 = vperm.slane %v2214_v53, 0 }
 0x644   : > { %2176 = vmatpush.msrb.mxu1 %v2121_v7  ;;  %v2217_v7 = vperm.slane %v2214_v53, 1 }
 0x645   : > { %v2020_v50 = vpop.f32.mrf.mxu2  ;;  %v2040_v13 = vpop.f32.mrf.mxu3 }
 0x646   : > { %v2043_v46 = vadd.f32 %v2020_v50, %v1911_v42  ;;  %v2044_v14 = vadd.f32 %v2040_v13, %v1912_v15  ;;  %v2211_v42 = vld [vmem:[#allocation8 + $0xe8] sm:$0xff]  ;;  %v2208_v15 = vld [vmem:[#allocation8 + $0xd0] sm:$0xff]  ;;  %v2206_v13 = vld [vmem:[#allocation8 + $0xc0] sm:$0xff] }
 0x647   : > { %2241 = vmatpush.msrb.mxu3 %v2211_v42  ;;  %2222 = vmatpush.msrb.mxu2 %v2208_v15 }
 0x648   : > { %v2053_v16 = vadd.f32 %v2049_v12, %v2043_v46  ;;  %v2054_v19 = vadd.f32 %v2050_v11, %v2044_v14  ;;  %v2209_v12 = vld [vmem:[#allocation8 + $0xd8] sm:$0xff]  ;;  %v2207_v46 = vld [vmem:[#allocation8 + $0xc8] sm:$0xff] }
 0x649   : > { %2242 = vmatpush.msrb.mxu3 %v2209_v12  ;;  %2223 = vmatpush.msrb.mxu2 %v2206_v13 }
 0x64a   : > { %v2055_v21 = vadd.f32 %v2645_v4, %v2053_v16  ;;  %v2056_v23 = vadd.f32 %v2646_v22, %v2054_v19  ;;  %v2204_v16 = vld [vmem:[#allocation8 + $0xb0] sm:$0xff]  ;;  %v2205_v19 = vld [vmem:[#allocation8 + $0xb8] sm:$0xff]  ;;  %v2202_v4 = vld [vmem:[#allocation8 + $0xa0] sm:$0xff] }
 0x64b   : > { %2243 = vmatpush.msrb.mxu3 %v2207_v46  ;;  %2224 = vmatpush.msrb.mxu2 %v2204_v16  ;;  %v2200_v22 = vld [vmem:[#allocation8 + $0x90] sm:$0xff] }
 0x64c   : > { %v2057_v24 = vadd.f32 %v2056_v23, %v2055_v21 }
 0x64d   : > { %2244 = vmatpush.msrb.mxu3 %v2205_v19  ;;  %2225 = vmatpush.msrb.mxu2 %v2202_v4 }
 0x64e   : > { %2058 = vadd.xlane.f32.xlu2 %v2057_v24  ;;  %v2198_v24 = vld [vmem:[#allocation8 + $0x80] sm:$0xff] }
 0x64f   : > { %2226 = vmatpush.msrb.mxu2 %v2200_v22 }
 0x651   : > { %2227 = vmatpush.msrb.mxu2 %v2198_v24 }
 0x653   : > { %2228 = vmatpush.msrb.mxu2 %v2196_v5 }
 0x655   : > { %2229 = vmatpush.msrb.mxu2 %v2194_v28 }
 0x657   : > { %2230 = vmatpush.msrb.mxu2 %v2192_v30 }
 0x6c1   : > { %v2059_v35 = vpop.xlane.xlu2 %2058 }
 0x6c2   : > { %v2067_v33 = vmul.f32 %v3243_v34, %v2059_v35 }
 0x6c4   : > { %v3246_v36 = vsub.f32 %v2055_v21, %v2067_v33  ;;  %v3248_v37 = vsub.f32 %v2056_v23, %v2067_v33  ;;  %v2203_v21 = vld [vmem:[#allocation8 + $0xa8] sm:$0xff]  ;;  %v2201_v23 = vld [vmem:[#allocation8 + $0x98] sm:$0xff]  ;;  %v2190_v33 = vld [vmem:[#allocation8 + $0x40] sm:$0xff] }
 0x6c5   : > { %2245 = vmatpush.msrb.mxu3 %v2203_v21  ;;  %2231 = vmatpush.msrb.mxu2 %v2190_v33 }
 0x6c6   : > { %v2070_v38 = vmul.f32 %v3246_v36, %v3246_v36  ;;  %v2071_v2 = vmul.f32 %v3248_v37, %v3248_v37 }
 0x6c7   : > { %2246 = vmatpush.msrb.mxu3 %v2201_v23  ;;  %2232 = vmatpush.msrb.mxu2 %v2188_v58 }
 0x6c8   : > { %v2072_v40 = vadd.f32 %v2071_v2, %v2070_v38  ;;  %v2191_v38 = vld [vmem:[#allocation8 + $0x48] sm:$0xff] }
 0x6c9   : > { %2247 = vmatpush.msrb.mxu3 %v2199_v25  ;;  %2233 = vmatpush.msrb.mxu2 %v2186_v60 }
 0x6ca   : > { %2073 = vadd.xlane.f32.xlu0 %v2072_v40  ;;  %v2089_v40 = vld [vmem:[%s3322_s5] sm:$0x3] }
 0x6cb   : > { %2248 = vmatpush.msrb.mxu3 %v2197_v27  ;;  %v2091_v44 = vperm.slane %v2089_v40, 0  ;;  %v2092_v45 = vperm.slane %v2089_v40, 1  ;;  %2234 = vmatpush.msrb.mxu2 %v2184_v59 }
 0x6cd   : > { %2249 = vmatpush.msrb.mxu3 %v2195_v29 }
 0x6cf   : > { %2250 = vmatpush.msrb.mxu3 %v2193_v32 }
 0x6d1   : > { %2251 = vmatpush.msrb.mxu3 %v2191_v38 }
 0x6d3   : > { %2252 = vmatpush.msrb.mxu3 %v2189_v48 }
 0x6d5   : > { %2253 = vmatpush.msrb.mxu3 %v2187_v61 }
 0x73d   : > { %v2074_v11 = vpop.xlane.xlu0 %2073 }
 0x73e   : > { %v2075_v50 = vmul.f32 %v2074_v11, %v3243_v34 }
 0x740   : > { %v2076_v14 = vadd.f32 1e-05, %v2075_v50 }
 0x742   : > { %2641 = vrsqrt.f32 %v2076_v14  ;;  %vm2083_vm6 = vweird.f32 %v2076_v14 }
 0x748   : > { %v2642_v26 = vpop.eup %2641 }
 0x749   : > { %v2078_v57 = vmul.f32 %v2642_v26, %v2076_v14  ;;  %vm2084_vm1 = vweird.f32 %v2642_v26 }
 0x74a   : > { %vm2085_vm7 = vmor %vm2083_vm6, %vm2084_vm1 }
 0x74b   : > { %v2079_v31 = vmul.f32 %v2642_v26, %v2078_v57 }
 0x74d   : > { %v2080_v35 = vmul.f32 0.5, %v2079_v31 }
 0x74f   : > { %v2081_v2 = vsub.f32 1.5, %v2080_v35 }
 0x751   : > { %v2082_v41 = vmul.f32 %v2642_v26, %v2081_v2 }
 0x753   : > { %v2086_v47 = vsel %vm2085_vm7, %v2642_v26, %v2082_v41 }
 0x754   : > { %v2087_v49 = vmul.f32 %v2086_v47, %v3246_v36  ;;  %v2088_v51 = vmul.f32 %v2086_v47, %v3248_v37  ;;  %v2185_v36 = vld [vmem:[#allocation8 + $0x18] sm:$0xff]  ;;  %v2182_v37 = vld [vmem:[#allocation8] sm:$0xff] }
 0x755   : > { %2254 = vmatpush.msrb.mxu3 %v2185_v36  ;;  %2235 = vmatpush.msrb.mxu2 %v2182_v37 }
 0x756   : > { %v2095_v55 = vmul.f32 %v2091_v44, %v2087_v49  ;;  %v2096_v56 = vmul.f32 %v2092_v45, %v2088_v51 }
 0x757   : > { %2255 = vmatpush.msrb.mxu3 %v2183_v39 }
 0x758   : > { %v2103_v3 = vadd.f32 %v2099_v52, %v2095_v55  ;;  %v2104_v17 = vadd.f32 %v2100_v54, %v2096_v56 }
 0x75a   : > { %2157 = vmatmul.f32.vlgmr.msrb.gmra.mxu0 %v2103_v3  ;;  %2177 = vmatmul.f32.vlgmr.msrb.gmra.mxu1 %v2104_v17 }
 0x7d7   : > { %v2158_v63 = vpop.f32.mrf.mxu0  ;;  %v2178_v20 = vpop.f32.mrf.mxu1 }
 0x7d8   : > { %v2159_v18 = vadd.f32 %v2606_v62, %v2158_v63 }
 0x7da   : > { %v2179_v0 = vadd.f32 %v2178_v20, %v2159_v18 }
 0x7dc   : > { %v2181_v1 = vmax.f32 %v2179_v0, 0.0 }
 0x7de   : > { %2236 = vmatmul.f32.vlgmr.msrb.gmra.mxu2 %v2181_v1  ;;  %2256 = vmatmul.f32.vlgmr.msrb.gmra.mxu3 %v2181_v1 }
 0x861   : > { %v2237_v8 = vpop.f32.mrf.mxu2  ;;  %v2257_v9 = vpop.f32.mrf.mxu3 }
 0x862   : > { %v2238_v10 = vadd.f32 %v2237_v8, %v2216_v6  ;;  %v2258_v42 = vadd.f32 %v2257_v9, %v2217_v7 }
 0x864   : > { %v2260_v15 = vadd.f32 %v2238_v10, %v2103_v3  ;;  %v2261_v12 = vadd.f32 %v2258_v42, %v2104_v17 }
 0x866   : > { %v2262_v11 = vadd.f32 %v2261_v12, %v2260_v15 }
 0x868   : > { %2263 = vadd.xlane.f32.xlu1 %v2262_v11 }
 0x8db   : > { %v2264_v50 = vpop.xlane.xlu1 %2263 }
 0x8dc   : > { %v2265_v13 = vmul.f32 %v2264_v50, %v3243_v34 }
 0x8de   : > { %v2266_v46 = vsub.f32 %v2260_v15, %v2265_v13  ;;  %v2267_v14 = vsub.f32 %v2261_v12, %v2265_v13 }
 0x8e0   : > { %v2268_v16 = vmul.f32 %v2266_v46, %v2266_v46  ;;  %v2269_v19 = vmul.f32 %v2267_v14, %v2267_v14 }
 0x8e2   : > { %v2270_v4 = vadd.f32 %v2269_v19, %v2268_v16 }
 0x8e4   : > { %2271 = vadd.xlane.f32.xlu2 %v2270_v4 }
 0x8e5   : > { %2794 = shalt.err (!%p2791_p8)
}
 0x8e6   : > { %2532 = dma.vmem_to_hbm [thread:$0]  (%p2970_p5), %s2328_s18, 128, %s2330_s15, %s2311_s22  }
 0x8e7   : > { %s3362_s26 = sld [smem:[#allocation24_spill]] }
 0x8e8   : > { %s3363_s29 = sld [smem:[#allocation25_spill]] }
 0x8e9   : > { %s3364_s18 = sld [smem:[#allocation26_spill]] }
 0x8ed   : > { %v2287_v27 = vld [vmem:[%s3362_s26] sm:$0x3] }
 0x8ee   : > { %v2295_v28 = vld [vmem:[%s3363_s29] sm:$0x3]  ;;  %v2290_v31 = vperm.slane %v2287_v27, 1 }
 0x8ef   : > { %v2297_v32 = vperm.slane %v2295_v28, 0  ;;  %v2298_v35 = vperm.slane %v2295_v28, 1  ;;  %s547_s15 = scalar_lea.vmem %s3364_s18, %s2469_s11 }
 0x957   : > { %v2272_v21 = vpop.xlane.xlu2 %2271 }
 0x958   : > { %v2273_v22 = vmul.f32 %v2272_v21, %v3243_v34  ;;  %v2289_v34 = vperm.slane %v2287_v27, 0 }
 0x95a   : > { %v2274_v23 = vadd.f32 1e-05, %v2273_v22 }
 0x95c   : > { %2643 = vrsqrt.f32 %v2274_v23  ;;  %vm2281_vm9 = vweird.f32 %v2274_v23 }
 0x962   : > { %v2644_v24 = vpop.eup %2643 }
 0x963   : > { %v2276_v25 = vmul.f32 %v2644_v24, %v2274_v23  ;;  %vm2282_vm8 = vweird.f32 %v2644_v24 }
 0x964   : > { %vm2283_vm10 = vmor %vm2281_vm9, %vm2282_vm8 }
 0x965   : > { %v2277_v26 = vmul.f32 %v2644_v24, %v2276_v25 }
 0x967   : > { %v2278_v5 = vmul.f32 0.5, %v2277_v26 }
 0x969   : > { %v2279_v57 = vsub.f32 1.5, %v2278_v5 }
 0x96b   : > { %v2280_v29 = vmul.f32 %v2644_v24, %v2279_v57 }
 0x96d   : > { %v2284_v30 = vsel %vm2283_vm10, %v2644_v24, %v2280_v29 }
 0x96e   : > { %v2285_v33 = vmul.f32 %v2284_v30, %v2266_v46  ;;  %v2286_v38 = vmul.f32 %v2284_v30, %v2267_v14 }
 0x970   : > { %v2293_v2 = vmul.f32 %v2289_v34, %v2285_v33  ;;  %v2294_v40 = vmul.f32 %v2290_v31, %v2286_v38 }
 0x972   : > { %v2301_v41 = vadd.f32 %v2297_v32, %v2293_v2  ;;  %v2302_v43 = vadd.f32 %v2298_v35, %v2294_v40 }
 0x974   : > { %2303 = vst [vmem:[%s547_s15] sm:$0xff] %v2301_v41 }
 0x975   : > { %2304 = vst [vmem:[%s547_s15 + $0x8] sm:$0xff] %v2302_v43 }
 0x976 PF: > { %s3365_s22 = sld [smem:[#allocation17_spill]] }
 0x977   : > { %s3366_s28 = sld [smem:[#allocation15_spill]] }
 0x97c   : > { %p2559_p5 = scmp.ge.s32.totalorder %s3365_s22, 2 }
 0x97d   : > { %s2349_s3 = sand.u32 1, %s3366_s28  }
 0x97e   : > { %p2548_p9 = pnand %p2559_p5, %p2974_p6  ;;  %s2350_s17 = scalar_lea.sflag [#allocation4], %s2349_s3 }
 0x980   : > { %p2549_p10 = pneg %p2548_p9 }
 0x982   : > { %2824 = dma.done.wait (%p2549_p10), %s2350_s17, 128  }
 0x983   : > { %2826 = vsyncadd (%p2549_p10), %s2350_s17, 4294967168  ;;  %s3368_s16 = sld [smem:[#allocation18_spill]]  ;;  %s3371_s29 = smov %s2833_s30 }
 0x984   : > { %s3369_s1 = sld [smem:[#allocation16_spill]] }
 0x985   : > { %s3370_s15 = sld [smem:[#allocation19_spill]] }
 0x989   : > { %p28_p11 = scmp.ge.s32.totalorder %s3368_s16, 4  }
 0x98a   : > { %s3372_s30 = smov %s3369_s1 }
 0x98b   :  { %30 = sbr.rel (!%p28_p11) target bundleno = 13 (0xd), region = 136 }
 0x990   :  { %2356 = vsyncpa [#allocation3], 1 }
 0x991   :  { %2358 = vsyncpa [#allocation3 + $0x1], 1 }
 0x992   :  { %2359 = vsyncpa [#allocation6], 1 }
 0x993   :  { %2360 = vsyncpa [#allocation9], 1 }
 0x994   :  { %2361 = vsyncpa [#allocation4], 1 }
 0x995   :  { %2363 = vsyncpa [#allocation4 + $0x1], 1 }

</bundles_post_ra>
